<compile_context>
chip_gen: v7x
topology: tpu7x:2x2x1
jax: 0.10.0
libtpu: 0.0.40
codegen_flags: <defaults>
</compile_context>

<pallas_src>
import numpy as np
import jax
import jax.numpy as jnp
from jax.experimental import pallas as pl
from jax.experimental.pallas import tpu as pltpu

# ---- SGAcroEnv default physical constants (module has no learnable params) ----
M1, M2 = 1.0, 1.0
L1 = 1.0
LC1, LC2 = 0.5, 0.5
I1, I2 = 0.2, 0.8
G = 9.8
DT = 0.05
ACT_HOLD = 1
MAX_TORQUE = 25.0
PI = float(np.pi)
TWO_PI = 2.0 * float(np.pi)
INV_TWO_PI = 1.0 / TWO_PI
HALF_DT = 0.5 * DT
DT_OVER_6 = DT / 6.0

# Trace-time folded dynamics constants (Python floats -> immediates in the kernel).
_M11_C = M1 * LC1 ** 2 + M2 * (L1 ** 2 + LC2 ** 2) + I1 + I2   # 2.5
_M11_K = 2.0 * M2 * L1 * LC2                                   # 1.0
_M12_C = M2 * LC2 ** 2 + I2                                    # 1.05
_M12_K = M2 * L1 * LC2                                         # 0.5
_M22 = M2 * LC2 ** 2 + I2                                      # 1.05
_HK = M2 * L1 * LC2                                            # 0.5
_PHI1_K = (M1 * LC1 + M2 * L1) * G                             # 14.7
_PHI2_K = M2 * LC2 * G                                         # 4.9

LANES = 128        # batch maps onto lanes (fast axis)
SUB = 8            # sublanes per f32 vreg; in-kernel strip size
R_TILE_MAX = 512   # max sublane rows per grid step (~64K elems, ~2.5 MiB block)


def _dynamics(th1, th2, th1d, th2d, tau):
    """Acrobot dynamics; closed-form 2x2 solve of M @ d2th = TAU - H - PHI.

    Returns raw derivatives (th1d, th2d, d2th1, d2th2); DT is folded into the
    RK4 weights by the caller.
    """
    c2 = jnp.cos(th2)
    s2 = jnp.sin(th2)
    m11 = _M11_C + _M11_K * c2
    m12 = _M12_C + _M12_K * c2
    # Coriolis / centrifugal:  h1 = -K*s2*th2d*(th2d + 2*th1d),  h2 = K*s2*th1d^2
    ks2 = _HK * s2
    h1 = -ks2 * th2d * (th2d + 2.0 * th1d)
    h2 = ks2 * th1d * th1d
    c1 = jnp.cos(th1)
    c12 = jnp.cos(th1 + th2)
    g2 = _PHI2_K * c12                       # phi2 (reused inside phi1)
    phi1 = _PHI1_K * c1 + g2
    b1 = -h1 - phi1                          # TAU[0] = 0
    b2 = tau - h2 - g2                       # TAU[1] = tau
    det = m11 * _M22 - m12 * m12             # well-conditioned: det in ~[1.27, 1.52]
    # EUP vrcp + ONE Newton step (3 VALU ops). Kept (rather than raw approx) because
    # |m22*b1 - m12*b2| can reach ~1e3 at the env's max velocities, so the raw-approx
    # relative error would be borderline against a 1e-3 absolute check; the Newton
    # step costs <5% of total VALU work and guarantees ~2^-24 relative error.
    r0 = pl.reciprocal(det, approx=True)
    inv_det = r0 * (2.0 - det * r0)
    d2th1 = (_M22 * b1 - m12 * b2) * inv_det
    d2th2 = (m11 * b2 - m12 * b1) * inv_det
    return th1d, th2d, d2th1, d2th2


def _wrap_pos(x):
    """x mod 2pi into [0, 2pi) via mul+floor (VALU) instead of EUP divide.

    Note: for x within ~1 ulp of a multiple of 2pi this can return 2pi or a tiny
    negative value (unlike np.mod); harmless for this env / tolerance.
    """
    return x - TWO_PI * jnp.floor(x * INV_TWO_PI)


def acro_step_kernel(s_ref, a_ref, ns_ref, rew_ref):
    # s_ref:   (4, r_tile, 128)   [th1, th2, th1d, th2d], batch on (sublane, lane)
    # a_ref:   (1, r_tile, 128)
    # ns_ref:  (4, r_tile, 128)   wrapped next state
    # rew_ref: (r_tile, 128)      reward
    n_strips = s_ref.shape[1] // SUB

    # Strip-mine the big block one (8,128) vreg-set at a time so the ~25 live
    # RK4 temporaries stay inside the 64-vreg file (no VMEM spills), while the
    # large BlockSpec tile amortizes grid/DMA overhead.
    @pl.loop(0, n_strips)
    def _(j):
        row = pl.multiple_of(j * SUB, SUB)
        rows = pl.ds(row, SUB)

        th1 = s_ref[0, rows, :]
        th2 = s_ref[1, rows, :]
        th1d = s_ref[2, rows, :]
        th2d = s_ref[3, rows, :]
        tau = jnp.clip(a_ref[0, rows, :], -MAX_TORQUE, MAX_TORQUE)

        def f(state):
            return _dynamics(state[0], state[1], state[2], state[3], tau)

        # Single RK4 step (act_hold = 1), DT folded into the stage weights.
        s0 = (th1, th2, th1d, th2d)
        d1 = f(s0)
        d2 = f(tuple(x + HALF_DT * d for x, d in zip(s0, d1)))
        d3 = f(tuple(x + HALF_DT * d for x, d in zip(s0, d2)))
        d4 = f(tuple(x + DT * d for x, d in zip(s0, d3)))
        ns = [x + DT_OVER_6 * (da + 2.0 * (db + dc) + dd)
              for x, da, db, dc, dd in zip(s0, d1, d2, d3, d4)]
        ns0, ns1, ns2, ns3 = ns

        # Reward on the un-wrapped integrated state (reward_fn runs before get_obs).
        rew_ref[rows, :] = jnp.sin(ns0) + jnp.sin(ns0 + ns1)

        # wrap(): th1 -> [0, 2pi), th2 -> [-pi, pi); dense unmasked (8,128) stores.
        ns_ref[0, rows, :] = _wrap_pos(ns0)
        ns_ref[1, rows, :] = _wrap_pos(ns1 + PI) - PI
        ns_ref[2, rows, :] = ns2
        ns_ref[3, rows, :] = ns3


def _round_up(x, m):
    return ((x + m - 1) // m) * m


def _default_r_tile(R):
    """Largest r_tile (multiple of SUB, divides R, <= R_TILE_MAX) preferring >=2 grid steps."""
    divs = [t for t in range(SUB, min(R, R_TILE_MAX) + 1, SUB) if R % t == 0]
    multi = [t for t in divs if R // t >= 2]
    if multi:
        return max(multi)
    return max(divs) if divs else R


def sgacro_forward_planar(sP, aP, r_tile=None):
    """Component-major, lane-dense entry point (the layout to keep resident in rollouts).

    sP: (4, R, 128) float32, aP: (1, R, 128) float32, R a multiple of 8.
    Returns (next_state (4, R, 128), reward (R, 128)).
    """
    C, R, L = sP.shape
    assert C == 4 and L == LANES and aP.shape == (1, R, LANES)
    assert R % SUB == 0, "R (sublane rows) must be a multiple of 8"
    if r_tile is None:
        r_tile = _default_r_tile(R)
    assert r_tile % SUB == 0 and R % r_tile == 0
    grid = (R // r_tile,)

    n_elem = R * LANES
    cost = pl.CostEstimate(
        flops=200 * n_elem,            # ~200 VALU ops / element (4 RK stages)
        transcendentals=22 * n_elem,   # 4x(cos,sin,cos,cos) + 2 sin + 4 rcp + 2 floor
        bytes_accessed=10 * 4 * n_elem,  # 4 in + 1 act + 4 out + 1 reward, f32
    )

    return pl.pallas_call(
        acro_step_kernel,
        out_shape=(
            jax.ShapeDtypeStruct((4, R, LANES), jnp.float32),
            jax.ShapeDtypeStruct((R, LANES), jnp.float32),
        ),
        grid=grid,
        in_specs=[
            pl.BlockSpec((4, r_tile, LANES), lambda i: (0, i, 0)),
            pl.BlockSpec((1, r_tile, LANES), lambda i: (0, i, 0)),
        ],
        out_specs=(
            pl.BlockSpec((4, r_tile, LANES), lambda i: (0, i, 0)),
            pl.BlockSpec((r_tile, LANES), lambda i: (i, 0)),
        ),
        compiler_params=pltpu.CompilerParams(
            dimension_semantics=("parallel",),   # megacore-shardable on v7x
        ),
        cost_estimate=cost,
    )(sP, aP)


def _plan_tiling(B):
    """Choose (rows R, r_tile) for a batch of B elements.

    Guarantees: R is a multiple of SUB and of r_tile, r_tile <= R_TILE_MAX, and
    the grid has >= 2 steps whenever there are >= 2 sublane strips of work
    (so v7x can use both TensorCores).
    """
    rows = _round_up(max(1, -(-B // LANES)), SUB)
    n_steps = max(2 if rows >= 2 * SUB else 1, -(-rows // R_TILE_MAX))
    r_tile = _round_up(-(-rows // n_steps), SUB)
    rows = n_steps * r_tile
    return rows, r_tile


def sgacro_forward(s, a, return_costs=False):
    """PyTorch-compatible wrapper of SGAcroEnvWrapper.forward.

    s: (B, 4) float32, a: (B, 1) float32.
    Returns ns (B, 4), and optionally (ns, reward (B,), terminal=False).
    """
    s = jnp.asarray(s, jnp.float32)
    a = jnp.asarray(a, jnp.float32)
    B = s.shape[0]

    R, r_tile = _plan_tiling(B)
    B_pad = R * LANES

    # TODO(synk): in a real rollout keep the state resident in the (4, R, 128)
    # component-major layout across steps (call sgacro_forward_planar directly)
    # so this pad/transpose relayout disappears from the hot path.
    s_pad = jnp.pad(s, ((0, B_pad - B), (0, 0)))
    a_pad = jnp.pad(a, ((0, B_pad - B), (0, 0)))
    sP = s_pad.T.reshape(4, R, LANES)
    aP = a_pad.T.reshape(1, R, LANES)

    nsP, rewP = sgacro_forward_planar(sP, aP, r_tile=r_tile)
    ns = nsP.reshape(4, B_pad).T[:B]        # (B, 4)
    reward = rewP.reshape(B_pad)[:B]        # (B,)
    terminal = False  # reward_fn always returns done=False in forward1
    # TODO(synk): SGAcroEnv.forward1 also advances the stateful clock self.t;
    # it has no effect on the returned values, so it is not modeled here.
    if return_costs:
        return ns, reward, terminal
    return ns


# ---------------- numpy reference (float64), mirrors the PyTorch env ----------------
def _ref_step(s, a):
    s = np.asarray(s, np.float64)
    a_scalar = np.asarray(a, np.float64).reshape(-1)[0]
    tau = float(np.clip(a_scalar, -MAX_TORQUE, MAX_TORQUE))

    def dyn(state):
        th1, th2, th1d, th2d = state
        m11 = M1 * LC1**2 + M2 * (L1**2 + LC2**2 + 2 * L1 * LC2 * np.cos(th2)) + I1 + I2
        m22 = M2 * LC2**2 + I2
        m12 = M2 * (LC2**2 + L1 * LC2 * np.cos(th2)) + I2
        M = np.array([[m11, m12], [m12, m22]])
        h1 = -M2 * L1 * LC2 * np.sin(th2) * th2d**2 - 2 * M2 * L1 * LC2 * np.sin(th2) * th2d * th1d
        h2 = M2 * L1 * LC2 * np.sin(th2) * th1d**2
        H = np.array([[h1], [h2]])
        phi1 = (M1 * LC1 + M2 * L1) * G * np.cos(th1) + M2 * LC2 * G * np.cos(th1 + th2)
        phi2 = M2 * LC2 * G * np.cos(th1 + th2)
        PHI = np.array([[phi1], [phi2]])
        TAU = np.array([[0.0], [tau]])
        d2 = np.linalg.solve(M, TAU - H - PHI)
        return np.array([th1d, th2d, d2[0, 0], d2[1, 0]])

    k1 = DT * dyn(s)
    k2 = DT * dyn(s + k1 / 2)
    k3 = DT * dyn(s + k2 / 2)
    k4 = DT * dyn(s + k3)
    ns = s + (k1 + 2 * k2 + 2 * k3 + k4) / 6.0
    r = np.sin(ns[0]) + np.sin(ns[0] + ns[1])
    obs = ns.copy()
    obs[0] = np.mod(obs[0], TWO_PI)
    obs[1] = np.mod(obs[1] + PI, TWO_PI) - PI
    return obs, r


def _make_batch(key, B):
    k1, k2, k3, k4, k5 = jax.random.split(key, 5)
    th1 = jax.random.uniform(k1, (B, 1), minval=-np.pi, maxval=np.pi)
    th2 = jax.random.uniform(k2, (B, 1), minval=-np.pi, maxval=np.pi)
    th1d = jax.random.uniform(k3, (B, 1), minval=-4 * np.pi, maxval=4 * np.pi)
    th2d = jax.random.uniform(k4, (B, 1), minval=-9 * np.pi, maxval=9 * np.pi)
    s = jnp.concatenate([th1, th2, th1d, th2d], axis=1).astype(jnp.float32)
    a = jax.random.uniform(k5, (B, 1), minval=-30.0, maxval=30.0).astype(jnp.float32)
    return s, a


def _check(s, a, ns, reward, idxs, rtol=1e-3, atol=1e-3):
    s_np, a_np = np.asarray(s), np.asarray(a)
    ns_np, r_np = np.asarray(ns), np.asarray(reward)
    for i in idxs:
        ref_ns, ref_r = _ref_step(s_np[i], a_np[i])
        assert np.allclose(ns_np[i], ref_ns, rtol=rtol, atol=atol), f"state mismatch @ {i}"
        assert np.allclose(r_np[i], ref_r, rtol=rtol, atol=atol), f"reward mismatch @ {i}"


if __name__ == "__main__":
    key = jax.random.PRNGKey(0)
    k_small, k_big = jax.random.split(key, 2)

    # --- small batch: grid=1, one (8,128) strip; full reference check ---
    B = 8
    s, a = _make_batch(k_small, B)
    ns, reward, terminal = sgacro_forward(s, a, return_costs=True)
    ns = jax.block_until_ready(ns)
    reward = jax.block_until_ready(reward)
    assert ns.shape == (B, 4) and reward.shape == (B,)
    assert terminal is False
    _check(s, a, ns, reward, range(B))

    # --- larger batch: exercises grid=2 (megacore path) + in-kernel strip loop ---
    B2 = 4096
    s2, a2 = _make_batch(k_big, B2)
    ns2, reward2, _ = sgacro_forward(s2, a2, return_costs=True)
    ns2 = jax.block_until_ready(ns2)
    reward2 = jax.block_until_ready(reward2)
    rng = np.random.default_rng(0)
    _check(s2, a2, ns2, reward2, rng.choice(B2, size=32, replace=False))

    print("KERNEL_OK")
</pallas_src>

<mosaic_0001>
module attributes {stable_mosaic.version = 11 : i64} {
  func.func @acro_step_kernel(%arg0: i32, %arg1: memref<4x8x128xf32, #tpu.memory_space<vmem>>, %arg2: memref<1x8x128xf32, #tpu.memory_space<vmem>>, %arg3: memref<4x8x128xf32, #tpu.memory_space<vmem>>, %arg4: memref<8x128xf32, #tpu.memory_space<vmem>>) attributes {dimension_semantics = [#tpu.dimension_semantics<parallel>], iteration_bounds = array<i64: 1>, scalar_prefetch = 0 : i64, scratch_operands = 0 : i64, tpu.core_type = #tpu.core_type<tc>, window_params = [{transform_indices = @transform_0, window_bounds = array<i64: 4, 8, 128>}, {transform_indices = @transform_1, window_bounds = array<i64: 1, 8, 128>}, {transform_indices = @transform_2, window_bounds = array<i64: 4, 8, 128>}, {transform_indices = @transform_3, window_bounds = array<i64: 8, 128>}]} {
    %c0_i32 = arith.constant 0 : i32
    %c1_i32 = arith.constant 1 : i32
    %0 = arith.muli %c0_i32, %c1_i32 : i32
    %c0_i32_0 = arith.constant 0 : i32
    %1 = arith.addi %c0_i32_0, %0 : i32
    %c8_i32 = arith.constant 8 : i32
    %2 = arith.muli %1, %c8_i32 : i32
    %3 = tpu.assume_multiple %2, 8 : i32
    %c0 = arith.constant 0 : index
    %4 = arith.index_cast %3 : i32 to index
    %c0_1 = arith.constant 0 : index
    %5 = vector.load %arg1[%c0, %4, %c0_1] : memref<4x8x128xf32, #tpu.memory_space<vmem>>, vector<1x8x128xf32>
    %6 = vector.shape_cast %5 : vector<1x8x128xf32> to vector<8x128xf32>
    %c1 = arith.constant 1 : index
    %7 = arith.index_cast %3 : i32 to index
    %c0_2 = arith.constant 0 : index
    %8 = vector.load %arg1[%c1, %7, %c0_2] : memref<4x8x128xf32, #tpu.memory_space<vmem>>, vector<1x8x128xf32>
    %9 = vector.shape_cast %8 : vector<1x8x128xf32> to vector<8x128xf32>
    %c2 = arith.constant 2 : index
    %10 = arith.index_cast %3 : i32 to index
    %c0_3 = arith.constant 0 : index
    %11 = vector.load %arg1[%c2, %10, %c0_3] : memref<4x8x128xf32, #tpu.memory_space<vmem>>, vector<1x8x128xf32>
    %12 = vector.shape_cast %11 : vector<1x8x128xf32> to vector<8x128xf32>
    %c3 = arith.constant 3 : index
    %13 = arith.index_cast %3 : i32 to index
    %c0_4 = arith.constant 0 : index
    %14 = vector.load %arg1[%c3, %13, %c0_4] : memref<4x8x128xf32, #tpu.memory_space<vmem>>, vector<1x8x128xf32>
    %15 = vector.shape_cast %14 : vector<1x8x128xf32> to vector<8x128xf32>
    %c0_5 = arith.constant 0 : index
    %16 = arith.index_cast %3 : i32 to index
    %c0_6 = arith.constant 0 : index
    %17 = vector.load %arg2[%c0_5, %16, %c0_6] : memref<1x8x128xf32, #tpu.memory_space<vmem>>, vector<1x8x128xf32>
    %18 = vector.shape_cast %17 : vector<1x8x128xf32> to vector<8x128xf32>
    %cst = arith.constant -2.500000e+01 : f32
    %cst_7 = arith.constant 2.500000e+01 : f32
    %19 = vector.broadcast %cst : f32 to vector<8x128xf32>
    %20 = arith.maximumf %19, %18 : vector<8x128xf32>
    %21 = vector.broadcast %cst_7 : f32 to vector<8x128xf32>
    %22 = arith.minimumf %21, %20 : vector<8x128xf32>
    %23 = math.cos %9 : vector<8x128xf32>
    %24 = math.sin %9 : vector<8x128xf32>
    %cst_8 = arith.constant 1.000000e+00 : f32
    %25 = vector.broadcast %cst_8 : f32 to vector<8x128xf32>
    %26 = arith.mulf %25, %23 : vector<8x128xf32>
    %cst_9 = arith.constant 2.500000e+00 : f32
    %27 = vector.broadcast %cst_9 : f32 to vector<8x128xf32>
    %28 = arith.addf %27, %26 : vector<8x128xf32>
    %cst_10 = arith.constant 5.000000e-01 : f32
    %29 = vector.broadcast %cst_10 : f32 to vector<8x128xf32>
    %30 = arith.mulf %29, %23 : vector<8x128xf32>
    %cst_11 = arith.constant 1.050000e+00 : f32
    %31 = vector.broadcast %cst_11 : f32 to vector<8x128xf32>
    %32 = arith.addf %31, %30 : vector<8x128xf32>
    %cst_12 = arith.constant 5.000000e-01 : f32
    %33 = vector.broadcast %cst_12 : f32 to vector<8x128xf32>
    %34 = arith.mulf %33, %24 : vector<8x128xf32>
    %cst_13 = arith.constant 0.000000e+00 : f32
    %35 = vector.broadcast %cst_13 : f32 to vector<8x128xf32>
    %36 = arith.subf %35, %34 : vector<8x128xf32>
    %37 = arith.mulf %36, %15 : vector<8x128xf32>
    %cst_14 = arith.constant 2.000000e+00 : f32
    %38 = vector.broadcast %cst_14 : f32 to vector<8x128xf32>
    %39 = arith.mulf %38, %12 : vector<8x128xf32>
    %40 = arith.addf %15, %39 : vector<8x128xf32>
    %41 = arith.mulf %37, %40 : vector<8x128xf32>
    %42 = arith.mulf %34, %12 : vector<8x128xf32>
    %43 = arith.mulf %42, %12 : vector<8x128xf32>
    %44 = math.cos %6 : vector<8x128xf32>
    %45 = arith.addf %6, %9 : vector<8x128xf32>
    %46 = math.cos %45 : vector<8x128xf32>
    %cst_15 = arith.constant 4.900000e+00 : f32
    %47 = vector.broadcast %cst_15 : f32 to vector<8x128xf32>
    %48 = arith.mulf %47, %46 : vector<8x128xf32>
    %cst_16 = arith.constant 1.470000e+01 : f32
    %49 = vector.broadcast %cst_16 : f32 to vector<8x128xf32>
    %50 = arith.mulf %49, %44 : vector<8x128xf32>
    %51 = arith.addf %50, %48 : vector<8x128xf32>
    %cst_17 = arith.constant 0.000000e+00 : f32
    %52 = vector.broadcast %cst_17 : f32 to vector<8x128xf32>
    %53 = arith.subf %52, %41 : vector<8x128xf32>
    %54 = arith.subf %53, %51 : vector<8x128xf32>
    %55 = arith.subf %22, %43 : vector<8x128xf32>
    %56 = arith.subf %55, %48 : vector<8x128xf32>
    %cst_18 = arith.constant 1.050000e+00 : f32
    %57 = vector.broadcast %cst_18 : f32 to vector<8x128xf32>
    %58 = arith.mulf %28, %57 : vector<8x128xf32>
    %59 = arith.mulf %32, %32 : vector<8x128xf32>
    %60 = arith.subf %58, %59 : vector<8x128xf32>
    %61 = tpu.reciprocal %60 {approx = true} : vector<8x128xf32> -> vector<8x128xf32>
    %62 = arith.mulf %60, %61 : vector<8x128xf32>
    %cst_19 = arith.constant 2.000000e+00 : f32
    %63 = vector.broadcast %cst_19 : f32 to vector<8x128xf32>
    %64 = arith.subf %63, %62 : vector<8x128xf32>
    %65 = arith.mulf %61, %64 : vector<8x128xf32>
    %cst_20 = arith.constant 1.050000e+00 : f32
    %66 = vector.broadcast %cst_20 : f32 to vector<8x128xf32>
    %67 = arith.mulf %66, %54 : vector<8x128xf32>
    %68 = arith.mulf %32, %56 : vector<8x128xf32>
    %69 = arith.subf %67, %68 : vector<8x128xf32>
    %70 = arith.mulf %69, %65 : vector<8x128xf32>
    %71 = arith.mulf %28, %56 : vector<8x128xf32>
    %72 = arith.mulf %32, %54 : vector<8x128xf32>
    %73 = arith.subf %71, %72 : vector<8x128xf32>
    %74 = arith.mulf %73, %65 : vector<8x128xf32>
    %cst_21 = arith.constant 2.500000e-02 : f32
    %75 = vector.broadcast %cst_21 : f32 to vector<8x128xf32>
    %76 = arith.mulf %75, %12 : vector<8x128xf32>
    %77 = arith.addf %6, %76 : vector<8x128xf32>
    %cst_22 = arith.constant 2.500000e-02 : f32
    %78 = vector.broadcast %cst_22 : f32 to vector<8x128xf32>
    %79 = arith.mulf %78, %15 : vector<8x128xf32>
    %80 = arith.addf %9, %79 : vector<8x128xf32>
    %cst_23 = arith.constant 2.500000e-02 : f32
    %81 = vector.broadcast %cst_23 : f32 to vector<8x128xf32>
    %82 = arith.mulf %81, %70 : vector<8x128xf32>
    %83 = arith.addf %12, %82 : vector<8x128xf32>
    %cst_24 = arith.constant 2.500000e-02 : f32
    %84 = vector.broadcast %cst_24 : f32 to vector<8x128xf32>
    %85 = arith.mulf %84, %74 : vector<8x128xf32>
    %86 = arith.addf %15, %85 : vector<8x128xf32>
    %87 = math.cos %80 : vector<8x128xf32>
    %88 = math.sin %80 : vector<8x128xf32>
    %cst_25 = arith.constant 1.000000e+00 : f32
    %89 = vector.broadcast %cst_25 : f32 to vector<8x128xf32>
    %90 = arith.mulf %89, %87 : vector<8x128xf32>
    %cst_26 = arith.constant 2.500000e+00 : f32
    %91 = vector.broadcast %cst_26 : f32 to vector<8x128xf32>
    %92 = arith.addf %91, %90 : vector<8x128xf32>
    %cst_27 = arith.constant 5.000000e-01 : f32
    %93 = vector.broadcast %cst_27 : f32 to vector<8x128xf32>
    %94 = arith.mulf %93, %87 : vector<8x128xf32>
    %cst_28 = arith.constant 1.050000e+00 : f32
    %95 = vector.broadcast %cst_28 : f32 to vector<8x128xf32>
    %96 = arith.addf %95, %94 : vector<8x128xf32>
    %cst_29 = arith.constant 5.000000e-01 : f32
    %97 = vector.broadcast %cst_29 : f32 to vector<8x128xf32>
    %98 = arith.mulf %97, %88 : vector<8x128xf32>
    %cst_30 = arith.constant 0.000000e+00 : f32
    %99 = vector.broadcast %cst_30 : f32 to vector<8x128xf32>
    %100 = arith.subf %99, %98 : vector<8x128xf32>
    %101 = arith.mulf %100, %86 : vector<8x128xf32>
    %cst_31 = arith.constant 2.000000e+00 : f32
    %102 = vector.broadcast %cst_31 : f32 to vector<8x128xf32>
    %103 = arith.mulf %102, %83 : vector<8x128xf32>
    %104 = arith.addf %86, %103 : vector<8x128xf32>
    %105 = arith.mulf %101, %104 : vector<8x128xf32>
    %106 = arith.mulf %98, %83 : vector<8x128xf32>
    %107 = arith.mulf %106, %83 : vector<8x128xf32>
    %108 = math.cos %77 : vector<8x128xf32>
    %109 = arith.addf %77, %80 : vector<8x128xf32>
    %110 = math.cos %109 : vector<8x128xf32>
    %cst_32 = arith.constant 4.900000e+00 : f32
    %111 = vector.broadcast %cst_32 : f32 to vector<8x128xf32>
    %112 = arith.mulf %111, %110 : vector<8x128xf32>
    %cst_33 = arith.constant 1.470000e+01 : f32
    %113 = vector.broadcast %cst_33 : f32 to vector<8x128xf32>
    %114 = arith.mulf %113, %108 : vector<8x128xf32>
    %115 = arith.addf %114, %112 : vector<8x128xf32>
    %cst_34 = arith.constant 0.000000e+00 : f32
    %116 = vector.broadcast %cst_34 : f32 to vector<8x128xf32>
    %117 = arith.subf %116, %105 : vector<8x128xf32>
    %118 = arith.subf %117, %115 : vector<8x128xf32>
    %119 = arith.subf %22, %107 : vector<8x128xf32>
    %120 = arith.subf %119, %112 : vector<8x128xf32>
    %cst_35 = arith.constant 1.050000e+00 : f32
    %121 = vector.broadcast %cst_35 : f32 to vector<8x128xf32>
    %122 = arith.mulf %92, %121 : vector<8x128xf32>
    %123 = arith.mulf %96, %96 : vector<8x128xf32>
    %124 = arith.subf %122, %123 : vector<8x128xf32>
    %125 = tpu.reciprocal %124 {approx = true} : vector<8x128xf32> -> vector<8x128xf32>
    %126 = arith.mulf %124, %125 : vector<8x128xf32>
    %cst_36 = arith.constant 2.000000e+00 : f32
    %127 = vector.broadcast %cst_36 : f32 to vector<8x128xf32>
    %128 = arith.subf %127, %126 : vector<8x128xf32>
    %129 = arith.mulf %125, %128 : vector<8x128xf32>
    %cst_37 = arith.constant 1.050000e+00 : f32
    %130 = vector.broadcast %cst_37 : f32 to vector<8x128xf32>
    %131 = arith.mulf %130, %118 : vector<8x128xf32>
    %132 = arith.mulf %96, %120 : vector<8x128xf32>
    %133 = arith.subf %131, %132 : vector<8x128xf32>
    %134 = arith.mulf %133, %129 : vector<8x128xf32>
    %135 = arith.mulf %92, %120 : vector<8x128xf32>
    %136 = arith.mulf %96, %118 : vector<8x128xf32>
    %137 = arith.subf %135, %136 : vector<8x128xf32>
    %138 = arith.mulf %137, %129 : vector<8x128xf32>
    %cst_38 = arith.constant 2.500000e-02 : f32
    %139 = vector.broadcast %cst_38 : f32 to vector<8x128xf32>
    %140 = arith.mulf %139, %83 : vector<8x128xf32>
    %141 = arith.addf %6, %140 : vector<8x128xf32>
    %cst_39 = arith.constant 2.500000e-02 : f32
    %142 = vector.broadcast %cst_39 : f32 to vector<8x128xf32>
    %143 = arith.mulf %142, %86 : vector<8x128xf32>
    %144 = arith.addf %9, %143 : vector<8x128xf32>
    %cst_40 = arith.constant 2.500000e-02 : f32
    %145 = vector.broadcast %cst_40 : f32 to vector<8x128xf32>
    %146 = arith.mulf %145, %134 : vector<8x128xf32>
    %147 = arith.addf %12, %146 : vector<8x128xf32>
    %cst_41 = arith.constant 2.500000e-02 : f32
    %148 = vector.broadcast %cst_41 : f32 to vector<8x128xf32>
    %149 = arith.mulf %148, %138 : vector<8x128xf32>
    %150 = arith.addf %15, %149 : vector<8x128xf32>
    %151 = math.cos %144 : vector<8x128xf32>
    %152 = math.sin %144 : vector<8x128xf32>
    %cst_42 = arith.constant 1.000000e+00 : f32
    %153 = vector.broadcast %cst_42 : f32 to vector<8x128xf32>
    %154 = arith.mulf %153, %151 : vector<8x128xf32>
    %cst_43 = arith.constant 2.500000e+00 : f32
    %155 = vector.broadcast %cst_43 : f32 to vector<8x128xf32>
    %156 = arith.addf %155, %154 : vector<8x128xf32>
    %cst_44 = arith.constant 5.000000e-01 : f32
    %157 = vector.broadcast %cst_44 : f32 to vector<8x128xf32>
    %158 = arith.mulf %157, %151 : vector<8x128xf32>
    %cst_45 = arith.constant 1.050000e+00 : f32
    %159 = vector.broadcast %cst_45 : f32 to vector<8x128xf32>
    %160 = arith.addf %159, %158 : vector<8x128xf32>
    %cst_46 = arith.constant 5.000000e-01 : f32
    %161 = vector.broadcast %cst_46 : f32 to vector<8x128xf32>
    %162 = arith.mulf %161, %152 : vector<8x128xf32>
    %cst_47 = arith.constant 0.000000e+00 : f32
    %163 = vector.broadcast %cst_47 : f32 to vector<8x128xf32>
    %164 = arith.subf %163, %162 : vector<8x128xf32>
    %165 = arith.mulf %164, %150 : vector<8x128xf32>
    %cst_48 = arith.constant 2.000000e+00 : f32
    %166 = vector.broadcast %cst_48 : f32 to vector<8x128xf32>
    %167 = arith.mulf %166, %147 : vector<8x128xf32>
    %168 = arith.addf %150, %167 : vector<8x128xf32>
    %169 = arith.mulf %165, %168 : vector<8x128xf32>
    %170 = arith.mulf %162, %147 : vector<8x128xf32>
    %171 = arith.mulf %170, %147 : vector<8x128xf32>
    %172 = math.cos %141 : vector<8x128xf32>
    %173 = arith.addf %141, %144 : vector<8x128xf32>
    %174 = math.cos %173 : vector<8x128xf32>
    %cst_49 = arith.constant 4.900000e+00 : f32
    %175 = vector.broadcast %cst_49 : f32 to vector<8x128xf32>
    %176 = arith.mulf %175, %174 : vector<8x128xf32>
    %cst_50 = arith.constant 1.470000e+01 : f32
    %177 = vector.broadcast %cst_50 : f32 to vector<8x128xf32>
    %178 = arith.mulf %177, %172 : vector<8x128xf32>
    %179 = arith.addf %178, %176 : vector<8x128xf32>
    %cst_51 = arith.constant 0.000000e+00 : f32
    %180 = vector.broadcast %cst_51 : f32 to vector<8x128xf32>
    %181 = arith.subf %180, %169 : vector<8x128xf32>
    %182 = arith.subf %181, %179 : vector<8x128xf32>
    %183 = arith.subf %22, %171 : vector<8x128xf32>
    %184 = arith.subf %183, %176 : vector<8x128xf32>
    %cst_52 = arith.constant 1.050000e+00 : f32
    %185 = vector.broadcast %cst_52 : f32 to vector<8x128xf32>
    %186 = arith.mulf %156, %185 : vector<8x128xf32>
    %187 = arith.mulf %160, %160 : vector<8x128xf32>
    %188 = arith.subf %186, %187 : vector<8x128xf32>
    %189 = tpu.reciprocal %188 {approx = true} : vector<8x128xf32> -> vector<8x128xf32>
    %190 = arith.mulf %188, %189 : vector<8x128xf32>
    %cst_53 = arith.constant 2.000000e+00 : f32
    %191 = vector.broadcast %cst_53 : f32 to vector<8x128xf32>
    %192 = arith.subf %191, %190 : vector<8x128xf32>
    %193 = arith.mulf %189, %192 : vector<8x128xf32>
    %cst_54 = arith.constant 1.050000e+00 : f32
    %194 = vector.broadcast %cst_54 : f32 to vector<8x128xf32>
    %195 = arith.mulf %194, %182 : vector<8x128xf32>
    %196 = arith.mulf %160, %184 : vector<8x128xf32>
    %197 = arith.subf %195, %196 : vector<8x128xf32>
    %198 = arith.mulf %197, %193 : vector<8x128xf32>
    %199 = arith.mulf %156, %184 : vector<8x128xf32>
    %200 = arith.mulf %160, %182 : vector<8x128xf32>
    %201 = arith.subf %199, %200 : vector<8x128xf32>
    %202 = arith.mulf %201, %193 : vector<8x128xf32>
    %cst_55 = arith.constant 5.000000e-02 : f32
    %203 = vector.broadcast %cst_55 : f32 to vector<8x128xf32>
    %204 = arith.mulf %203, %147 : vector<8x128xf32>
    %205 = arith.addf %6, %204 : vector<8x128xf32>
    %cst_56 = arith.constant 5.000000e-02 : f32
    %206 = vector.broadcast %cst_56 : f32 to vector<8x128xf32>
    %207 = arith.mulf %206, %150 : vector<8x128xf32>
    %208 = arith.addf %9, %207 : vector<8x128xf32>
    %cst_57 = arith.constant 5.000000e-02 : f32
    %209 = vector.broadcast %cst_57 : f32 to vector<8x128xf32>
    %210 = arith.mulf %209, %198 : vector<8x128xf32>
    %211 = arith.addf %12, %210 : vector<8x128xf32>
    %cst_58 = arith.constant 5.000000e-02 : f32
    %212 = vector.broadcast %cst_58 : f32 to vector<8x128xf32>
    %213 = arith.mulf %212, %202 : vector<8x128xf32>
    %214 = arith.addf %15, %213 : vector<8x128xf32>
    %215 = math.cos %208 : vector<8x128xf32>
    %216 = math.sin %208 : vector<8x128xf32>
    %cst_59 = arith.constant 1.000000e+00 : f32
    %217 = vector.broadcast %cst_59 : f32 to vector<8x128xf32>
    %218 = arith.mulf %217, %215 : vector<8x128xf32>
    %cst_60 = arith.constant 2.500000e+00 : f32
    %219 = vector.broadcast %cst_60 : f32 to vector<8x128xf32>
    %220 = arith.addf %219, %218 : vector<8x128xf32>
    %cst_61 = arith.constant 5.000000e-01 : f32
    %221 = vector.broadcast %cst_61 : f32 to vector<8x128xf32>
    %222 = arith.mulf %221, %215 : vector<8x128xf32>
    %cst_62 = arith.constant 1.050000e+00 : f32
    %223 = vector.broadcast %cst_62 : f32 to vector<8x128xf32>
    %224 = arith.addf %223, %222 : vector<8x128xf32>
    %cst_63 = arith.constant 5.000000e-01 : f32
    %225 = vector.broadcast %cst_63 : f32 to vector<8x128xf32>
    %226 = arith.mulf %225, %216 : vector<8x128xf32>
    %cst_64 = arith.constant 0.000000e+00 : f32
    %227 = vector.broadcast %cst_64 : f32 to vector<8x128xf32>
    %228 = arith.subf %227, %226 : vector<8x128xf32>
    %229 = arith.mulf %228, %214 : vector<8x128xf32>
    %cst_65 = arith.constant 2.000000e+00 : f32
    %230 = vector.broadcast %cst_65 : f32 to vector<8x128xf32>
    %231 = arith.mulf %230, %211 : vector<8x128xf32>
    %232 = arith.addf %214, %231 : vector<8x128xf32>
    %233 = arith.mulf %229, %232 : vector<8x128xf32>
    %234 = arith.mulf %226, %211 : vector<8x128xf32>
    %235 = arith.mulf %234, %211 : vector<8x128xf32>
    %236 = math.cos %205 : vector<8x128xf32>
    %237 = arith.addf %205, %208 : vector<8x128xf32>
    %238 = math.cos %237 : vector<8x128xf32>
    %cst_66 = arith.constant 4.900000e+00 : f32
    %239 = vector.broadcast %cst_66 : f32 to vector<8x128xf32>
    %240 = arith.mulf %239, %238 : vector<8x128xf32>
    %cst_67 = arith.constant 1.470000e+01 : f32
    %241 = vector.broadcast %cst_67 : f32 to vector<8x128xf32>
    %242 = arith.mulf %241, %236 : vector<8x128xf32>
    %243 = arith.addf %242, %240 : vector<8x128xf32>
    %cst_68 = arith.constant 0.000000e+00 : f32
    %244 = vector.broadcast %cst_68 : f32 to vector<8x128xf32>
    %245 = arith.subf %244, %233 : vector<8x128xf32>
    %246 = arith.subf %245, %243 : vector<8x128xf32>
    %247 = arith.subf %22, %235 : vector<8x128xf32>
    %248 = arith.subf %247, %240 : vector<8x128xf32>
    %cst_69 = arith.constant 1.050000e+00 : f32
    %249 = vector.broadcast %cst_69 : f32 to vector<8x128xf32>
    %250 = arith.mulf %220, %249 : vector<8x128xf32>
    %251 = arith.mulf %224, %224 : vector<8x128xf32>
    %252 = arith.subf %250, %251 : vector<8x128xf32>
    %253 = tpu.reciprocal %252 {approx = true} : vector<8x128xf32> -> vector<8x128xf32>
    %254 = arith.mulf %252, %253 : vector<8x128xf32>
    %cst_70 = arith.constant 2.000000e+00 : f32
    %255 = vector.broadcast %cst_70 : f32 to vector<8x128xf32>
    %256 = arith.subf %255, %254 : vector<8x128xf32>
    %257 = arith.mulf %253, %256 : vector<8x128xf32>
    %cst_71 = arith.constant 1.050000e+00 : f32
    %258 = vector.broadcast %cst_71 : f32 to vector<8x128xf32>
    %259 = arith.mulf %258, %246 : vector<8x128xf32>
    %260 = arith.mulf %224, %248 : vector<8x128xf32>
    %261 = arith.subf %259, %260 : vector<8x128xf32>
    %262 = arith.mulf %261, %257 : vector<8x128xf32>
    %263 = arith.mulf %220, %248 : vector<8x128xf32>
    %264 = arith.mulf %224, %246 : vector<8x128xf32>
    %265 = arith.subf %263, %264 : vector<8x128xf32>
    %266 = arith.mulf %265, %257 : vector<8x128xf32>
    %267 = arith.addf %83, %147 : vector<8x128xf32>
    %cst_72 = arith.constant 2.000000e+00 : f32
    %268 = vector.broadcast %cst_72 : f32 to vector<8x128xf32>
    %269 = arith.mulf %268, %267 : vector<8x128xf32>
    %270 = arith.addf %12, %269 : vector<8x128xf32>
    %271 = arith.addf %270, %211 : vector<8x128xf32>
    %cst_73 = arith.constant 0.00833333377 : f32
    %272 = vector.broadcast %cst_73 : f32 to vector<8x128xf32>
    %273 = arith.mulf %272, %271 : vector<8x128xf32>
    %274 = arith.addf %6, %273 : vector<8x128xf32>
    %275 = arith.addf %86, %150 : vector<8x128xf32>
    %cst_74 = arith.constant 2.000000e+00 : f32
    %276 = vector.broadcast %cst_74 : f32 to vector<8x128xf32>
    %277 = arith.mulf %276, %275 : vector<8x128xf32>
    %278 = arith.addf %15, %277 : vector<8x128xf32>
    %279 = arith.addf %278, %214 : vector<8x128xf32>
    %cst_75 = arith.constant 0.00833333377 : f32
    %280 = vector.broadcast %cst_75 : f32 to vector<8x128xf32>
    %281 = arith.mulf %280, %279 : vector<8x128xf32>
    %282 = arith.addf %9, %281 : vector<8x128xf32>
    %283 = arith.addf %134, %198 : vector<8x128xf32>
    %cst_76 = arith.constant 2.000000e+00 : f32
    %284 = vector.broadcast %cst_76 : f32 to vector<8x128xf32>
    %285 = arith.mulf %284, %283 : vector<8x128xf32>
    %286 = arith.addf %70, %285 : vector<8x128xf32>
    %287 = arith.addf %286, %262 : vector<8x128xf32>
    %cst_77 = arith.constant 0.00833333377 : f32
    %288 = vector.broadcast %cst_77 : f32 to vector<8x128xf32>
    %289 = arith.mulf %288, %287 : vector<8x128xf32>
    %290 = arith.addf %12, %289 : vector<8x128xf32>
    %291 = arith.addf %138, %202 : vector<8x128xf32>
    %cst_78 = arith.constant 2.000000e+00 : f32
    %292 = vector.broadcast %cst_78 : f32 to vector<8x128xf32>
    %293 = arith.mulf %292, %291 : vector<8x128xf32>
    %294 = arith.addf %74, %293 : vector<8x128xf32>
    %295 = arith.addf %294, %266 : vector<8x128xf32>
    %cst_79 = arith.constant 0.00833333377 : f32
    %296 = vector.broadcast %cst_79 : f32 to vector<8x128xf32>
    %297 = arith.mulf %296, %295 : vector<8x128xf32>
    %298 = arith.addf %15, %297 : vector<8x128xf32>
    %299 = math.sin %274 : vector<8x128xf32>
    %300 = arith.addf %274, %282 : vector<8x128xf32>
    %301 = math.sin %300 : vector<8x128xf32>
    %302 = arith.addf %299, %301 : vector<8x128xf32>
    %303 = arith.index_cast %3 : i32 to index
    %c0_80 = arith.constant 0 : index
    %304 = vector.load %arg4[%303, %c0_80] : memref<8x128xf32, #tpu.memory_space<vmem>>, vector<8x128xf32>
    tpu.vector_store %arg4[%303, %c0_80], %302 {strides = array<i32>} : memref<8x128xf32, #tpu.memory_space<vmem>>, vector<8x128xf32>,
    %cst_81 = arith.constant 0.159154937 : f32
    %305 = vector.broadcast %cst_81 : f32 to vector<8x128xf32>
    %306 = arith.mulf %274, %305 : vector<8x128xf32>
    %307 = math.floor %306 : vector<8x128xf32>
    %cst_82 = arith.constant 6.28318548 : f32
    %308 = vector.broadcast %cst_82 : f32 to vector<8x128xf32>
    %309 = arith.mulf %308, %307 : vector<8x128xf32>
    %310 = arith.subf %274, %309 : vector<8x128xf32>
    %c0_83 = arith.constant 0 : index
    %311 = arith.index_cast %3 : i32 to index
    %c0_84 = arith.constant 0 : index
    %312 = vector.load %arg3[%c0_83, %311, %c0_84] : memref<4x8x128xf32, #tpu.memory_space<vmem>>, vector<1x8x128xf32>
    %313 = vector.shape_cast %312 : vector<1x8x128xf32> to vector<8x128xf32>
    %314 = vector.shape_cast %310 : vector<8x128xf32> to vector<1x8x128xf32>
    tpu.vector_store %arg3[%c0_83, %311, %c0_84], %314 {strides = array<i32>} : memref<4x8x128xf32, #tpu.memory_space<vmem>>, vector<1x8x128xf32>,
    %cst_85 = arith.constant 3.14159274 : f32
    %315 = vector.broadcast %cst_85 : f32 to vector<8x128xf32>
    %316 = arith.addf %282, %315 : vector<8x128xf32>
    %cst_86 = arith.constant 0.159154937 : f32
    %317 = vector.broadcast %cst_86 : f32 to vector<8x128xf32>
    %318 = arith.mulf %316, %317 : vector<8x128xf32>
    %319 = math.floor %318 : vector<8x128xf32>
    %cst_87 = arith.constant 6.28318548 : f32
    %320 = vector.broadcast %cst_87 : f32 to vector<8x128xf32>
    %321 = arith.mulf %320, %319 : vector<8x128xf32>
    %322 = arith.subf %316, %321 : vector<8x128xf32>
    %cst_88 = arith.constant 3.14159274 : f32
    %323 = vector.broadcast %cst_88 : f32 to vector<8x128xf32>
    %324 = arith.subf %322, %323 : vector<8x128xf32>
    %c1_89 = arith.constant 1 : index
    %325 = arith.index_cast %3 : i32 to index
    %c0_90 = arith.constant 0 : index
    %326 = vector.load %arg3[%c1_89, %325, %c0_90] : memref<4x8x128xf32, #tpu.memory_space<vmem>>, vector<1x8x128xf32>
    %327 = vector.shape_cast %326 : vector<1x8x128xf32> to vector<8x128xf32>
    %328 = vector.shape_cast %324 : vector<8x128xf32> to vector<1x8x128xf32>
    tpu.vector_store %arg3[%c1_89, %325, %c0_90], %328 {strides = array<i32>} : memref<4x8x128xf32, #tpu.memory_space<vmem>>, vector<1x8x128xf32>,
    %c2_91 = arith.constant 2 : index
    %329 = arith.index_cast %3 : i32 to index
    %c0_92 = arith.constant 0 : index
    %330 = vector.load %arg3[%c2_91, %329, %c0_92] : memref<4x8x128xf32, #tpu.memory_space<vmem>>, vector<1x8x128xf32>
    %331 = vector.shape_cast %330 : vector<1x8x128xf32> to vector<8x128xf32>
    %332 = vector.shape_cast %290 : vector<8x128xf32> to vector<1x8x128xf32>
    tpu.vector_store %arg3[%c2_91, %329, %c0_92], %332 {strides = array<i32>} : memref<4x8x128xf32, #tpu.memory_space<vmem>>, vector<1x8x128xf32>,
    %c3_93 = arith.constant 3 : index
    %333 = arith.index_cast %3 : i32 to index
    %c0_94 = arith.constant 0 : index
    %334 = vector.load %arg3[%c3_93, %333, %c0_94] : memref<4x8x128xf32, #tpu.memory_space<vmem>>, vector<1x8x128xf32>
    %335 = vector.shape_cast %334 : vector<1x8x128xf32> to vector<8x128xf32>
    %336 = vector.shape_cast %298 : vector<8x128xf32> to vector<1x8x128xf32>
    tpu.vector_store %arg3[%c3_93, %333, %c0_94], %336 {strides = array<i32>} : memref<4x8x128xf32, #tpu.memory_space<vmem>>, vector<1x8x128xf32>,
    %c1_i32_95 = arith.constant 1 : i32
    return
  }
  func.func @transform_0(%arg0: i32) -> (i32, i32, i32) {
    %c0_i32 = arith.constant 0 : i32
    %c0_i32_0 = arith.constant 0 : i32
    %c0_i32_1 = arith.constant 0 : i32
    return %c0_i32, %arg0, %c0_i32_0 : i32, i32, i32
  }
  func.func @transform_1(%arg0: i32) -> (i32, i32, i32) {
    %c0_i32 = arith.constant 0 : i32
    %c0_i32_0 = arith.constant 0 : i32
    %c0_i32_1 = arith.constant 0 : i32
    return %c0_i32, %arg0, %c0_i32_0 : i32, i32, i32
  }
  func.func @transform_2(%arg0: i32) -> (i32, i32, i32) {
    %c0_i32 = arith.constant 0 : i32
    %c0_i32_0 = arith.constant 0 : i32
    %c0_i32_1 = arith.constant 0 : i32
    return %c0_i32, %arg0, %c0_i32_0 : i32, i32, i32
  }
  func.func @transform_3(%arg0: i32) -> (i32, i32) {
    %c0_i32 = arith.constant 0 : i32
    %c0_i32_0 = arith.constant 0 : i32
    return %arg0, %c0_i32 : i32, i32
  }
}

</mosaic_0001>

<bundles_post_ra>
// kernel: tpu_custom_call.1
= control target key start
LH: loop header
LB: loop body
LE: loop exit
PB: predicated region body
PF: predicated region fallthrough
CT: control target
= control target key end

     0   :  { %9 = vsyncpa [#allocation3], 0  ;;  %s4062_s0 = inlined_call_operand.hbm [shape: f32[4,8,128], index: 0, kind: input, shape index: {}]   ;;  %s4063_s1 = inlined_call_operand.hbm [shape: f32[1,8,128], index: 1, kind: input, shape index: {}]   ;;  %s4064_s2 = inlined_call_operand.hbm [shape: f32[4,8,128], index: 2, kind: output, shape index: {0}]   ;;  %s4065_s3 = inlined_call_operand.hbm [shape: f32[8,128], index: 3, kind: output, shape index: {1}]  }
   0x1   :  { %10 = vsyncpa [#allocation6], 0 }
   0x2   :  { %11 = vsyncpa [#allocation4], 0 }
   0x3   :  { %12 = vsyncpa [#allocation9], 0  ;;  %s2466_s12 = smov [#allocation2]   ;;  %s2370_s16 = scalar_lea.hbm %s4062_s0, 512 }
   0x4   :  { %s18_s13 = sshll.u32 %s2466_s12, 4  ;;  %p2371_p0 = scmp.ne.s32.totalorder %s4062_s0, %s2370_s16  ;;  %s19_s13 = int_to_ptr.vmem [resolvable:$true] %s18_s13 }
   0x5   :  { %p2374_p1 = scmp.lt.u32.totalorder %s2370_s16, %s4062_s0 }
   0x7   :  { %p2376_p2 = pnand %p2374_p1, %p2371_p0 }
   0x9   :  { %2379 = shalt.err (!%p2376_p2)
}
   0xa   :  { %s2380_s21 = scalar_lea.vmem %s19_s13, 512  ;;  %p2385_p4 = scmp.lt.s32.totalorder %s19_s13, %s19_s13 }
   0xb   :  { %p2381_p3 = scmp.ne.s32.totalorder %s19_s13, %s2380_s21  ;;  %p2386_p5 = scmp.lt.s32.totalorder %s2380_s21, %s2380_s21 }
   0xd   :  { %p2387_p6 = por %p2386_p5, %p2385_p4 }
   0xf   :  { %p2388_p7 = pnand %p2387_p6, %p2381_p3 }
  0x11   :  { %2391 = shalt.err (!%p2388_p7)
}
  0x12   :  { %s2467_s22 = smov 128   ;;  %s2468_s23 = smov 8  }
  0x13   :  { %24 = dma.hbm_to_vmem [thread:$0]  %s4062_s0, 512, %s19_s13, [#allocation3], %s2467_s22, %s2467_s22, %s2468_s23  }
  0x14   :  { %s2469_s26 = smov [#allocation5]   ;;  %s2392_s30 = scalar_lea.hbm %s4063_s1, 128 }
  0x15   :  { %s31_s27 = sshll.u32 %s2469_s26, 4  ;;  %p2393_p8 = scmp.ne.s32.totalorder %s4063_s1, %s2392_s30  ;;  %s32_s27 = int_to_ptr.vmem [resolvable:$true] %s31_s27 }
  0x16   :  { %p2396_p9 = scmp.lt.u32.totalorder %s2392_s30, %s4063_s1 }
  0x18   :  { %p2398_p10 = pnand %p2396_p9, %p2393_p8 }
  0x1a   :  { %2401 = shalt.err (!%p2398_p10)
}
  0x1b   :  { %s2402_s8 = scalar_lea.vmem %s32_s27, 128  ;;  %p2407_p12 = scmp.lt.s32.totalorder %s32_s27, %s32_s27 }
  0x1c   :  { %p2403_p11 = scmp.ne.s32.totalorder %s32_s27, %s2402_s8  ;;  %p2408_p13 = scmp.lt.s32.totalorder %s2402_s8, %s2402_s8 }
  0x1e   :  { %p2409_p0 = por %p2408_p13, %p2407_p12 }
  0x20   :  { %p2410_p1 = pnand %p2409_p0, %p2403_p11 }
  0x22   :  { %2413 = shalt.err (!%p2410_p1)
}
  0x23   :  { %34 = dma.hbm_to_vmem [thread:$0]  %s4063_s1, 128, %s32_s27, [#allocation6]  }
  0x24   :  { %2458 = dma.done.wait [#allocation3], 512  }
  0x25   :  { %2459 = vsyncadd [#allocation3], 4294966784 }
  0x26   :  { %2460 = dma.done.wait [#allocation6], 128  }
  0x27   :  { %2461 = vsyncadd [#allocation6], 4294967168  ;;  %v2525_v0 = vld [vmem:[#allocation2 + $0x8] sm:$0xff]  ;;  %v2527_v1 = vld [vmem:[#allocation2] sm:$0xff]  ;;  %v2470_v26 = vmov 683565275  }
  0x28   :  { %v54_v2 = vand.u32 2147483647, %v2525_v0  ;;  %v57_v3 = vand.u32 2139095040, %v2525_v0  ;;  %v272_v4 = vand.u32 2147483647, %v2527_v1  ;;  %v275_v6 = vand.u32 2139095040, %v2527_v1 }
  0x29   :  { %v2539_v11 = vadd.f32 %v2525_v0, %v2527_v1  ;;  %v2471_v28 = vmov 2475754826   ;;  %v2472_v30 = vmov 2131351028   ;;  %v2473_v32 = vmov 2102212464  }
  0x2a   :  { %v58_v5 = vshrl.u32 %v57_v3, 23  ;;  %v61_v7 = vand.u32 8388607, %v54_v2  ;;  %v279_v8 = vand.u32 8388607, %v272_v4  ;;  %v276_v10 = vshrl.u32 %v275_v6, 23 }
  0x2b   :  { %v379_v16 = vand.u32 2139095040, %v2539_v11  ;;  %v2474_v34 = vmov 920167782   ;;  %v2475_v42 = vmov 1326507024   ;;  %vm56_vm13 = vcmp.lt.s32.totalorder %v2525_v0, 0 }
  0x2c   :  { %v2157_v9 = vadd.s32 4294967169, %v58_v5  ;;  %v2165_v13 = vadd.s32 4294967169, %v276_v10  ;;  %v62_v14 = vor.u32 8388608, %v61_v7  ;;  %v280_v15 = vor.u32 8388608, %v279_v8  ;;  %s2476_s1 = smov [#allocation7]  }
  0x2d   :  { %v380_v19 = vshrl.u32 %v379_v16, 23  ;;  %s2123_s10 = sshll.u32 %s2476_s1, 4  ;;  %s2124_s10 = int_to_ptr.vmem [resolvable:$true] %s2123_s10 }
  0x2e   :  { %v64_v12 = vadd.s32 1, %v2157_v9  ;;  %v282_v17 = vadd.s32 1, %v2165_v13  ;;  %v2542_v22 = vshll.u32 %v62_v14, 8  ;;  %v2544_v24 = vshll.u32 %v280_v15, 8  ;;  %s2414_s11 = scalar_lea.vmem %s2124_s10, 512  ;;  %p2419_p3 = scmp.lt.s32.totalorder %s2124_s10, %s2124_s10 }
  0x2f   :  { %v2169_v36 = vadd.s32 4294967169, %v380_v19  ;;  %p2415_p2 = scmp.ne.s32.totalorder %s2124_s10, %s2414_s11  ;;  %p2420_p4 = scmp.lt.s32.totalorder %s2414_s11, %s2414_s11 }
  0x30   :  { %vm65_vm0 = vcmp.gt.s32.totalorder %v64_v12, 0  ;;  %vm283_vm1 = vcmp.gt.s32.totalorder %v282_v17, 0 }
  0x31   :  { %v66_v18 = vsel %vm65_vm0, %v64_v12, 0  ;;  %v284_v23 = vsel %vm283_vm1, %v282_v17, 0  ;;  %p2421_p5 = por %p2420_p4, %p2419_p3 }
  0x32   :  { %v67_v20 = vshrl.u32 %v66_v18, 5  ;;  %v68_v21 = vand.u32 31, %v66_v18  ;;  %v285_v49 = vshrl.u32 %v284_v23, 5  ;;  %v286_v50 = vand.u32 31, %v284_v23 }
  0x33   :  { %p2422_p6 = pnand %p2421_p5, %p2415_p2 }
  0x34   :  { %v69_v25 = vsub.s32 32, %v68_v21  ;;  %v71_v27 = vshll.u32 %v2470_v26, %v68_v21  ;;  %v74_v29 = vshll.u32 %v2471_v28, %v68_v21  ;;  %v77_v31 = vshll.u32 %v2472_v30, %v68_v21 }
  0x35   :  { %v80_v33 = vshll.u32 %v2473_v32, %v68_v21  ;;  %v83_v35 = vshll.u32 %v2474_v34, %v68_v21  ;;  %vm86_vm2 = vcmp.lt.s32.totalorder %v67_v20, 1  ;;  %vm87_vm3 = vcmp.lt.s32.totalorder %v67_v20, 2 }
  0x36   :  { %v70_v37 = vshrl.u32 %v2470_v26, %v69_v25  ;;  %v72_v38 = vshrl.u32 %v2471_v28, %v69_v25  ;;  %v75_v39 = vshrl.u32 %v2472_v30, %v69_v25  ;;  %v78_v40 = vshrl.u32 %v2473_v32, %v69_v25 }
  0x37   :  { %v81_v41 = vshrl.u32 %v2474_v34, %v69_v25  ;;  %v84_v43 = vshrl.u32 %v2475_v42, %v69_v25  ;;  %vm88_vm4 = vcmp.lt.s32.totalorder %v67_v20, 3  ;;  %vm89_vm5 = vcmp.lt.s32.totalorder %v67_v20, 4 }
  0x38   :  { %v73_v44 = vor.u32 %v72_v38, %v71_v27  ;;  %v76_v45 = vor.u32 %v75_v39, %v74_v29  ;;  %v79_v46 = vor.u32 %v78_v40, %v77_v31  ;;  %v287_v58 = vsub.s32 32, %v286_v50 }
  0x39   :  { %v82_v47 = vor.u32 %v81_v41, %v80_v33  ;;  %v85_v48 = vor.u32 %v84_v43, %v83_v35  ;;  %v289_v62 = vshll.u32 %v2470_v26, %v286_v50  ;;  %v292_v13 = vshll.u32 %v2471_v28, %v286_v50 }
  0x3a   :  { %v90_v51 = vsel %vm86_vm2, %v70_v37, %v73_v44  ;;  %v91_v52 = vsel %vm89_vm5, %v79_v46, 2102212464  ;;  %v94_v53 = vsel %vm86_vm2, %v73_v44, %v76_v45  ;;  %v98_v54 = vsel %vm86_vm2, %v76_v45, %v79_v46 }
  0x3b   :  { %v92_v55 = vsel %vm88_vm4, %v76_v45, %v91_v52  ;;  %v95_v56 = vsel %vm89_vm5, %v82_v47, 920167782  ;;  %v99_v57 = vsel %vm89_vm5, %v85_v48, 1326507024  ;;  %v288_v6 = vshrl.u32 %v2470_v26, %v287_v58 }
  0x3c   :  { %v93_v59 = vsel %vm87_vm3, %v90_v51, %v92_v55  ;;  %v96_v60 = vsel %vm88_vm4, %v79_v46, %v95_v56  ;;  %v100_v61 = vsel %vm88_vm4, %v82_v47, %v99_v57  ;;  %v290_v12 = vshrl.u32 %v2471_v28, %v287_v58 }
  0x3d   :  { %v97_v63 = vsel %vm87_vm3, %v94_v53, %v96_v60  ;;  %v101_v3 = vsel %vm87_vm3, %v98_v54, %v100_v61  ;;  %v109_v5 = vmul.u32 %v2542_v22, %v93_v59  ;;  %v293_v14 = vshrl.u32 %v2472_v30, %v287_v58  ;;  %v2602_v53 = vld [vmem:[#allocation2 + $0x18] sm:$0xff] }
  0x3e   :  { %v2570_v7 = vmul.u32.u64.low %v2542_v22, %v101_v3  ;;  %v2571_v8 = vmul.u32.u64.high %v2542_v22, %v101_v3, %v2570_v7  ;;  %v2574_v9 = vmul.u32.u64.low %v2542_v22, %v97_v63  ;;  %v2575_v10 = vmul.u32.u64.high %v2542_v22, %v97_v63, %v2574_v9  ;;  %v2615_v63 = vld [vmem:[#allocation2 + $0x10] sm:$0xff] }
  0x3f   :  { %v295_v15 = vshll.u32 %v2472_v30, %v286_v50  ;;  %v296_v16 = vshrl.u32 %v2473_v32, %v287_v58  ;;  %v298_v17 = vshll.u32 %v2473_v32, %v286_v50  ;;  %v299_v18 = vshrl.u32 %v2474_v34, %v287_v58 }
  0x40   :  { %v301_v19 = vshll.u32 %v2474_v34, %v286_v50  ;;  %v291_v20 = vor.u32 %v290_v12, %v289_v62  ;;  %v294_v21 = vor.u32 %v293_v14, %v292_v13  ;;  %v302_v22 = vshrl.u32 %v2475_v42, %v287_v58 }
  0x41   :  { %vm304_vm6 = vcmp.lt.s32.totalorder %v285_v49, 1  ;;  %vm111_vm7 = vc.u32 %v2571_v8, %v2574_v9  ;;  %v112_v23 = vadd.s32 1, %v2575_v10  ;;  %v297_v25 = vor.u32 %v296_v16, %v295_v15 }
  0x42   :  { %v386_v27 = vadd.s32 1, %v2169_v36  ;;  %v300_v29 = vor.u32 %v299_v18, %v298_v17  ;;  %v303_v31 = vor.u32 %v302_v22, %v301_v19  ;;  %vm305_vm8 = vcmp.lt.s32.totalorder %v285_v49, 2 }
  0x43   :  { %vm306_vm9 = vcmp.lt.s32.totalorder %v285_v49, 3  ;;  %v113_v33 = vsel %vm111_vm7, %v112_v23, %v2575_v10  ;;  %vm307_vm10 = vcmp.lt.s32.totalorder %v285_v49, 4  ;;  %v308_v35 = vsel %vm304_vm6, %v288_v6, %v291_v20 }
  0x44   :  { %v312_v37 = vsel %vm304_vm6, %v291_v20, %v294_v21  ;;  %v114_v38 = vadd.s32 %v113_v33, %v109_v5  ;;  %v309_v39 = vsel %vm307_vm10, %v297_v25, 2102212464  ;;  %v313_v40 = vsel %vm307_vm10, %v300_v29, 920167782 }
  0x45   :  { %v316_v41 = vsel %vm304_vm6, %v294_v21, %v297_v25  ;;  %v310_v43 = vsel %vm306_vm9, %v294_v21, %v309_v39  ;;  %v314_v44 = vsel %vm306_vm9, %v297_v25, %v313_v40  ;;  %v317_v45 = vsel %vm307_vm10, %v303_v31, 1326507024 }
  0x46   :  { %vm387_vm11 = vcmp.gt.s32.totalorder %v386_v27, 0  ;;  %v115_v36 = vadd.s32 536870912, %v114_v38  ;;  %v315_v46 = vsel %vm305_vm8, %v312_v37, %v314_v44  ;;  %v318_v47 = vsel %vm306_vm9, %v300_v29, %v317_v45 }
  0x47   :  { %v311_v48 = vsel %vm305_vm8, %v308_v35, %v310_v43  ;;  %v319_v50 = vsel %vm305_vm8, %v316_v41, %v318_v47  ;;  %v2598_v51 = vmul.u32.u64.low %v2544_v24, %v315_v46  ;;  %v2599_v52 = vmul.u32.u64.high %v2544_v24, %v315_v46, %v2598_v51 }
  0x48   :  { %v2604_v54 = vshrl.u32 %v115_v36, 30  ;;  %v2607_v55 = vmul.u32.u64.low %v2544_v24, %v319_v50  ;;  %v2608_v56 = vmul.u32.u64.high %v2544_v24, %v319_v50, %v2607_v55  ;;  %v388_v57 = vsel %vm387_vm11, %v386_v27, 0 }
  0x49   :  { %v376_v58 = vand.u32 2147483647, %v2539_v11  ;;  %v390_v59 = vand.u32 31, %v388_v57  ;;  %v327_v60 = vmul.u32 %v2544_v24, %v311_v48  ;;  %v330_v61 = vadd.s32 1, %v2599_v52 }
  0x4a   :  { %v117_v49 = vshll.u32 %v2604_v54, 30  ;;  %v503_v62 = vmul.f32 0.025, %v2602_v53  ;;  %vm329_vm12 = vc.u32 %v2608_v56, %v2598_v51  ;;  %v2623_v24 = vmul.f32 2.0, %v2615_v63 }
  0x4b   :  { %v391_v5 = vsub.s32 32, %v390_v59  ;;  %v331_v6 = vsel %vm329_vm12, %v330_v61, %v2599_v52  ;;  %v383_v7 = vand.u32 8388607, %v376_v58  ;;  %v393_v13 = vshll.u32 %v2470_v26, %v390_v59 }
  0x4c   :  { %v118_v3 = vsub.s32 %v114_v38, %v117_v49  ;;  %v332_v12 = vadd.s32 %v331_v6, %v327_v60  ;;  %v2627_v14 = vadd.f32 %v503_v62, %v2525_v0  ;;  %v396_v17 = vshll.u32 %v2471_v28, %v390_v59 }
  0x4d   :  { %v394_v16 = vshrl.u32 %v2471_v28, %v391_v5  ;;  %v397_v18 = vshrl.u32 %v2472_v30, %v391_v5  ;;  %v384_v20 = vor.u32 8388608, %v383_v7  ;;  %v399_v21 = vshll.u32 %v2472_v30, %v390_v59 }
  0x4e   :  { %v120_v10 = vsub.s32 0, %v118_v3  ;;  %v333_v19 = vadd.s32 536870912, %v332_v12  ;;  %v400_v22 = vshrl.u32 %v2473_v32, %v391_v5  ;;  %v389_v25 = vshrl.u32 %v388_v57, 5 }
  0x4f   :  { %v402_v27 = vshll.u32 %v2473_v32, %v390_v59  ;;  %v403_v29 = vshrl.u32 %v2474_v34, %v391_v5  ;;  %v110_v31 = vadd.s32 %v2574_v9, %v2571_v8  ;;  %v140_v33 = vsub.s32 4, %v2604_v54 }
  0x50   :  { %v2158_v15 = vmin.u32 %v120_v10, %v118_v3  ;;  %v2640_v35 = vshrl.u32 %v333_v19, 30  ;;  %v512_v37 = vand.u32 2139095040, %v2627_v14  ;;  %v392_v39 = vshrl.u32 %v2470_v26, %v391_v5 }
  0x51   :  { %v395_v40 = vor.u32 %v394_v16, %v393_v13  ;;  %v398_v41 = vor.u32 %v397_v18, %v396_v17  ;;  %v401_v44 = vor.u32 %v400_v22, %v399_v21  ;;  %v405_v45 = vshll.u32 %v2474_v34, %v390_v59 }
  0x52   :  { %v122_v23 = vclz %v2158_v15  ;;  %v335_v43 = vshll.u32 %v2640_v35, 30  ;;  %v406_v36 = vshrl.u32 %v2475_v42, %v391_v5  ;;  %v404_v8 = vor.u32 %v403_v29, %v402_v27 }
  0x53   :  { %vm408_vm15 = vcmp.lt.s32.totalorder %v389_v25, 1  ;;  %vm411_vm0 = vcmp.lt.s32.totalorder %v389_v25, 4  ;;  %vm409_vm1 = vcmp.lt.s32.totalorder %v389_v25, 2  ;;  %vm410_vm2 = vcmp.lt.s32.totalorder %v389_v25, 3 }
  0x54   :  { %v2159_v38 = vadd.s32 4294967294, %v122_v23  ;;  %v2647_v46 = vsub.s32 %v332_v12, %v335_v43  ;;  %v413_v47 = vsel %vm411_vm0, %v401_v44, 2102212464  ;;  %v407_v57 = vor.u32 %v406_v36, %v405_v45 }
  0x55   :  { %v412_v59 = vsel %vm408_vm15, %v392_v39, %v395_v40  ;;  %v414_v49 = vsel %vm410_vm2, %v398_v41, %v413_v47  ;;  %v416_v62 = vsel %vm408_vm15, %v395_v40, %v398_v41  ;;  %v417_v5 = vsel %vm411_vm0, %v404_v8, 920167782 }
  0x56   :  { %vm2160_vm14 = vcmp.lt.s32.totalorder %v2159_v38, 0  ;;  %v338_v55 = vsub.s32 0, %v2647_v46  ;;  %vm2657_vm3 = vcmp.le.f32.partialorder %v54_v2, 0.7853982  ;;  %v424_v10 = vshll.u32 %v384_v20, 8 }
  0x57   :  { %v125_v9 = vsel %vm2160_vm14, 0, %v2159_v38  ;;  %v418_v15 = vsel %vm410_vm2, %v401_v44, %v417_v5  ;;  %v420_v16 = vsel %vm408_vm15, %v398_v41, %v401_v44  ;;  %v415_v18 = vsel %vm409_vm1, %v412_v59, %v414_v49 }
  0x58   :  { %v126_v48 = vsub.s32 32, %v125_v9  ;;  %v127_v50 = vshll.u32 %v118_v3, %v125_v9  ;;  %v130_v52 = vsub.s32 4294967266, %v125_v9  ;;  %v141_v3 = vsel %vm56_vm13, %v140_v33, %v2604_v54 }
  0x59   :  { %v2166_v7 = vmin.u32 %v338_v55, %v2647_v46  ;;  %v419_v2 = vsel %vm409_vm1, %v416_v62, %v418_v15  ;;  %v421_v19 = vsel %vm411_vm0, %v407_v57, 1326507024  ;;  %v513_v23 = vshrl.u32 %v512_v37, 23 }
  0x5a   :  { %v128_v60 = vshrl.u32 %v110_v31, %v126_v48  ;;  %v131_v61 = vadd.s32 127, %v130_v52  ;;  %v422_v54 = vsel %vm410_vm2, %v404_v8, %v421_v19  ;;  %v143_v41 = vsel %vm2657_vm3, 0, %v141_v3  ;;  %v51_v3 = vld [vmem:[#allocation5] sm:$0xff] }
  0x5b   :  { %v340_v17 = vclz %v2166_v7  ;;  %v423_v20 = vsel %vm409_vm1, %v420_v16, %v422_v54  ;;  %v2672_v29 = vmul.u32.u64.low %v424_v10, %v419_v2  ;;  %v2673_v31 = vmul.u32.u64.high %v424_v10, %v419_v2, %v2672_v29 }
  0x5c   :  { %v129_v12 = vor.u32 %v128_v60, %v127_v50  ;;  %v132_v13 = vshll.u32 %v131_v61, 23  ;;  %v2676_v38 = vmul.u32.u64.low %v424_v10, %v423_v20  ;;  %v2677_v39 = vmul.u32.u64.high %v424_v10, %v423_v20, %v2676_v38 }
  0x5d   :  { %v2167_v27 = vadd.s32 4294967294, %v340_v17  ;;  %v2173_v40 = vadd.s32 4294967169, %v513_v23  ;;  %vm274_vm4 = vcmp.lt.s32.totalorder %v2527_v1, 0  ;;  %v328_v37 = vadd.s32 %v2598_v51, %v2608_v56 }
  0x5e   :  { %v133_v21 = vor.u32 4788187, %v132_v13  ;;  %v136_v22 = vcvt.s32.f32 %v129_v12  ;;  %v431_v44 = vmul.u32 %v424_v10, %v415_v18  ;;  %v434_v47 = vadd.s32 1, %v2673_v31 }
  0x5f   :  { %vm2168_vm5 = vcmp.lt.s32.totalorder %v2167_v27, 0  ;;  %v519_v45 = vadd.s32 1, %v2173_v40  ;;  %v358_v50 = vsub.s32 4, %v2640_v35  ;;  %vm433_vm6 = vc.u32 %v2677_v39, %v2672_v29 }
  0x60   :  { %v134_v33 = vand.u32 2147483647, %v133_v21  ;;  %v343_v43 = vsel %vm2168_vm5, 0, %v2167_v27  ;;  %v435_v56 = vsel %vm433_vm6, %v434_v47, %v2673_v31  ;;  %v250_v59 = vadd.s32 3, %v143_v41 }
  0x61   :  { %v344_v36 = vsub.s32 32, %v343_v43  ;;  %v345_v8 = vshll.u32 %v2647_v46, %v343_v43  ;;  %v348_v9 = vsub.s32 4294967266, %v343_v43  ;;  %vm520_vm7 = vcmp.gt.s32.totalorder %v519_v45, 0 }
  0x62   :  { %v137_v25 = vmul.f32 %v136_v22, %v134_v33  ;;  %v521_v55 = vsel %vm520_vm7, %v519_v45, 0  ;;  %v436_v46 = vadd.s32 %v435_v56, %v431_v44  ;;  %v509_v49 = vand.u32 2147483647, %v2627_v14 }
  0x63   :  { %v346_v52 = vshrl.u32 %v328_v37, %v344_v36  ;;  %v349_v51 = vadd.s32 127, %v348_v9  ;;  %v501_v5 = vmul.f32 0.025, %v2615_v63  ;;  %v2697_v7 = vand.u32 3, %v143_v41 }
  0x64   :  { %v138_v48 = vxor.u32 2147483648, %v137_v25  ;;  %v437_v10 = vadd.s32 536870912, %v436_v46  ;;  %v523_v12 = vand.u32 31, %v521_v55  ;;  %v359_v16 = vsel %vm274_vm4, %v358_v50, %v2640_v35 }
  0x65   :  { %v347_v61 = vor.u32 %v346_v52, %v345_v8  ;;  %v350_v62 = vshll.u32 %v349_v51, 23  ;;  %v2702_v17 = vand.u32 3, %v250_v59  ;;  %v516_v18 = vand.u32 8388607, %v509_v49 }
  0x66   :  { %v139_v57 = vsel %vm56_vm13, %v138_v48, %v137_v25  ;;  %v2704_v6 = vshrl.u32 %v437_v10, 30  ;;  %v2708_v2 = vclamps-f32 %v51_v3, 25.0  ;;  %v2712_v19 = vadd.f32 %v2623_v24, %v2602_v53 }
  0x67   :  { %v142_v60 = vsel %vm2657_vm3, %v2525_v0, %v139_v57  ;;  %v351_v13 = vor.u32 4788187, %v350_v62  ;;  %v354_v15 = vcvt.s32.f32 %v347_v61  ;;  %vm2716_vm8 = vcmp.le.f32.partialorder %v272_v4, 0.7853982 }
  0x68   :  { %2298 = vcosq.f32 %v142_v60  ;;  %v361_v22 = vsel %vm2716_vm8, 0, %v359_v16  ;;  %v439_v54 = vshll.u32 %v2704_v6, 30  ;;  %v2724_v23 = vadd.f32 %v501_v5, %v2527_v1 }
  0x69   :  { %2300 = vsinq.f32 %v142_v60  ;;  %v352_v35 = vand.u32 2147483647, %v351_v13  ;;  %v524_v27 = vsub.s32 32, %v523_v12  ;;  %vm146_vm9 = vweird.f32 %v2525_v0 }
  0x6a   :  { %vm148_vm10 = vcmp.lt.s32.totalorder %v2697_v7, 2  ;;  %vm149_vm11 = vcmp.eq.s32.totalorder %v2697_v7, 0  ;;  %vm152_vm12 = vcmp.eq.s32.totalorder %v2697_v7, 2  ;;  %vm253_vm13 = vcmp.eq.s32.totalorder %v2702_v17, 0 }
  0x6b   :  { %v355_v4 = vmul.f32 %v354_v15, %v352_v35  ;;  %vm256_vm14 = vcmp.eq.s32.totalorder %v2702_v17, 2  ;;  %v2732_v24 = vsub.s32 %v436_v46, %v439_v54  ;;  %v517_v20 = vor.u32 8388608, %v516_v18 }
  0x6c   :  { %v2734_v33 = vand.u32 3, %v361_v22  ;;  %v526_v38 = vshll.u32 %v2470_v26, %v523_v12  ;;  %v529_v40 = vshll.u32 %v2471_v28, %v523_v12  ;;  %vm252_vm15 = vcmp.lt.s32.totalorder %v2702_v17, 2 }
  0x6d   :  { %v356_v31 = vxor.u32 2147483648, %v355_v4  ;;  %v442_v41 = vsub.s32 0, %v2732_v24  ;;  %v527_v37 = vshrl.u32 %v2471_v28, %v524_v27  ;;  %v530_v25 = vshrl.u32 %v2472_v30, %v524_v27 }
  0x6e   :  { %v535_v43 = vshll.u32 %v2473_v32, %v523_v12  ;;  %v536_v45 = vshrl.u32 %v2474_v34, %v524_v27  ;;  %v538_v36 = vshll.u32 %v2474_v34, %v523_v12  ;;  %v539_v8 = vshrl.u32 %v2475_v42, %v524_v27 }
  0x6f   :  { %v357_v44 = vsel %vm274_vm4, %v356_v31, %v355_v4  ;;  %v432_v47 = vadd.s32 %v2672_v29, %v2677_v39  ;;  %v2170_v48 = vmin.u32 %v442_v41, %v2732_v24  ;;  %v2751_v50 = vshrl.u32 %v521_v55, 5 }
  0x70   :  { %v2753_v52 = vshll.u32 %v517_v20, 8  ;;  %v360_v57 = vsel %vm2716_vm8, %v2527_v1, %v357_v44  ;;  %v532_v59 = vshll.u32 %v2472_v30, %v523_v12  ;;  %v533_v46 = vshrl.u32 %v2473_v32, %v524_v27 }
  0x71   :  { %v444_v61 = vclz %v2170_v48  ;;  %v525_v29 = vshrl.u32 %v2470_v26, %v524_v27  ;;  %v528_v39 = vor.u32 %v527_v37, %v526_v38  ;;  %v531_v62 = vor.u32 %v530_v25, %v529_v40 }
  0x72   :  { %v2299_v9 = vpop.eup %2298  ;;  %v537_v5 = vor.u32 %v536_v45, %v535_v43  ;;  %v540_v3 = vor.u32 %v539_v8, %v538_v36  ;;  %2302 = vcosq.f32 %v360_v57  ;;  %vm544_vm0 = vcmp.lt.s32.totalorder %v2751_v50, 4 }
  0x73   :  { %v2301_v51 = vpop.eup %2300  ;;  %v153_v56 = vxor.u32 2147483648, %v2299_v9  ;;  %v2171_v13 = vadd.s32 4294967294, %v444_v61  ;;  %2304 = vsinq.f32 %v360_v57  ;;  %v534_v15 = vor.u32 %v533_v46, %v532_v59 }
  0x74   :  { %v150_v60 = vxor.u32 2147483648, %v2301_v51  ;;  %vm541_vm1 = vcmp.lt.s32.totalorder %v2751_v50, 1  ;;  %vm378_vm2 = vcmp.lt.s32.totalorder %v2539_v11, 0  ;;  %vm543_vm4 = vcmp.lt.s32.totalorder %v2751_v50, 3 }
  0x75   :  { %v154_v55 = vsel %vm152_vm12, %v153_v56, %v2301_v51  ;;  %v258_v21 = vsel %vm256_vm14, %v153_v56, %v2301_v51  ;;  %vm2172_vm3 = vcmp.lt.s32.totalorder %v2171_v13, 0  ;;  %v554_v7 = vsel %vm544_vm0, %v540_v3, 1326507024 }
  0x76   :  { %v151_v10 = vsel %vm149_vm11, %v2299_v9, %v150_v60  ;;  %v255_v18 = vsel %vm253_vm13, %v2299_v9, %v150_v60  ;;  %v447_v22 = vsel %vm2172_vm3, 0, %v2171_v13  ;;  %v550_v20 = vsel %vm544_vm0, %v537_v5, 920167782 }
  0x77   :  { %v155_v12 = vsel %vm148_vm10, %v151_v10, %v154_v55  ;;  %v448_v54 = vsub.s32 32, %v447_v22  ;;  %v449_v27 = vshll.u32 %v2732_v24, %v447_v22  ;;  %v452_v4 = vsub.s32 4294967266, %v447_v22 }
  0x78   :  { %v156_v16 = vsel %vm146_vm9, nan, %v155_v12  ;;  %v259_v31 = vsel %vm252_vm15, %v255_v18, %v258_v21  ;;  %v462_v38 = vsub.s32 4, %v2704_v6  ;;  %vm542_vm5 = vcmp.lt.s32.totalorder %v2751_v50, 2 }
  0x79   :  { %v262_v35 = vmul.f32 0.5, %v156_v16  ;;  %v546_v40 = vsel %vm544_vm0, %v534_v15, 2102212464  ;;  %v450_v41 = vshrl.u32 %v432_v47, %v448_v54  ;;  %v453_v37 = vadd.s32 127, %v452_v4 }
  0x7a   :  { %v553_v25 = vsel %vm541_vm1, %v531_v62, %v534_v15  ;;  %v555_v24 = vsel %vm543_vm4, %v537_v5, %v554_v7  ;;  %v2792_v43 = vadd.f32 2.5, %v156_v16  ;;  %v549_v17 = vsel %vm541_vm1, %v528_v39, %v531_v62 }
  0x7b   :  { %v2794_v44 = vadd.f32 1.05, %v262_v35  ;;  %v551_v45 = vsel %vm543_vm4, %v534_v15, %v550_v20  ;;  %v260_v36 = vsel %vm146_vm9, nan, %v259_v31  ;;  %v451_v8 = vor.u32 %v450_v41, %v449_v27 }
  0x7c   :  { %v454_v9 = vshll.u32 %v453_v37, 23  ;;  %v730_v47 = vand.u32 2139095040, %v2724_v23  ;;  %vm2805_vm6 = vcmp.le.f32.partialorder %v376_v58, 0.7853982  ;;  %v545_v51 = vsel %vm541_vm1, %v525_v29, %v528_v39  ;;  %v2303_v57 = vpop.eup %2302 }
  0x7d   :  { %v547_v56 = vsel %vm543_vm4, %v531_v62, %v546_v40  ;;  %v556_v0 = vsel %vm542_vm5, %v553_v25, %v555_v24  ;;  %vm366_vm7 = vcmp.lt.s32.totalorder %v2734_v33, 2  ;;  %v458_v46 = vcvt.s32.f32 %v451_v8  ;;  %v2305_v61 = vpop.eup %2304 }
  0x7e   :  { %v455_v59 = vor.u32 4788187, %v454_v9  ;;  %v552_v58 = vsel %vm542_vm5, %v549_v17, %v551_v45  ;;  %v731_v60 = vshrl.u32 %v730_v47, 23  ;;  %v264_v55 = vmul.f32 0.5, %v260_v36 }
  0x7f   :  { %v463_v29 = vsel %vm378_vm2, %v462_v38, %v2704_v6  ;;  %v486_v39 = vmul.f32 1.05, %v2792_v43  ;;  %v487_v62 = vmul.f32 %v2794_v44, %v2794_v44  ;;  %vm367_vm8 = vcmp.eq.s32.totalorder %v2734_v33, 0 }
  0x80   :  { %v456_v5 = vand.u32 2147483647, %v455_v59  ;;  %v2826_v3 = vmul.u32.u64.low %v2753_v52, %v556_v0  ;;  %v2827_v10 = vmul.u32.u64.high %v2753_v52, %v556_v0, %v2826_v3  ;;  %v548_v13 = vsel %vm542_vm5, %v545_v51, %v547_v56 }
  0x81   :  { %v2832_v12 = vmul.u32.u64.low %v2753_v52, %v552_v58  ;;  %v2833_v15 = vmul.u32.u64.high %v2753_v52, %v552_v58, %v2832_v12  ;;  %v2181_v6 = vadd.s32 4294967169, %v731_v60  ;;  %vm364_vm9 = vweird.f32 %v2527_v1 }
  0x82   :  { %v368_v16 = vxor.u32 2147483648, %v2305_v61  ;;  %v371_v18 = vxor.u32 2147483648, %v2303_v57  ;;  %v459_v21 = vmul.f32 %v458_v46, %v456_v5  ;;  %v465_v35 = vsel %vm2805_vm6, 0, %v463_v29 }
  0x83   :  { %v265_v22 = vsub.f32 0.0, %v264_v55  ;;  %vm370_vm10 = vcmp.eq.s32.totalorder %v2734_v33, 2  ;;  %v2840_v7 = vsub.f32 %v486_v39, %v487_v62  ;;  %v737_v50 = vadd.s32 1, %v2181_v6 }
  0x84   :  { %v270_v54 = vmul.f32 %v264_v55, %v2615_v63  ;;  %v460_v27 = vxor.u32 2147483648, %v459_v21  ;;  %v564_v4 = vmul.u32 %v2753_v52, %v548_v13  ;;  %vm566_vm11 = vc.u32 %v2827_v10, %v2832_v12 }
  0x85   :  { %v2846_v20 = vand.u32 3, %v465_v35  ;;  %v567_v31 = vadd.s32 1, %v2833_v15  ;;  %v727_v38 = vand.u32 2147483647, %v2724_v23  ;;  %vm738_vm12 = vcmp.gt.s32.totalorder %v737_v50, 0 }
  0x86   :  { %v369_v40 = vsel %vm367_vm8, %v2303_v57, %v368_v16  ;;  %v372_v41 = vsel %vm370_vm10, %v371_v18, %v2305_v61  ;;  %v461_v37 = vsel %vm378_vm2, %v460_v27, %v459_v21  ;;  %v739_v25 = vsel %vm738_vm12, %v737_v50, 0 }
  0x87   :  { %v464_v52 = vsel %vm2805_vm6, %v2539_v11, %v461_v37  ;;  %2306 = vrcp.f32 %v2840_v7  ;;  %v568_v24 = vsel %vm566_vm11, %v567_v31, %v2833_v15  ;;  %v741_v17 = vand.u32 31, %v739_v25 }
  0x88   :  { %v266_v45 = vmul.f32 %v265_v22, %v2602_v53  ;;  %v2861_v36 = vmul.f32 %v270_v54, %v2615_v63  ;;  %2308 = vcosq.f32 %v464_v52  ;;  %v569_v8 = vadd.s32 %v568_v24, %v564_v4 }
  0x89   :  { %v373_v9 = vsel %vm366_vm7, %v369_v40, %v372_v41  ;;  %2310 = vsinq.f32 %v464_v52  ;;  %v742_v47 = vsub.s32 32, %v741_v17  ;;  %v2867_v48 = vadd.f32 %v2627_v14, %v2724_v23 }
  0x8a   :  { %vm474_vm13 = vcmp.eq.s32.totalorder %v2846_v20, 2  ;;  %v570_v51 = vadd.s32 536870912, %v569_v8  ;;  %v744_v56 = vshll.u32 %v2470_v26, %v741_v17  ;;  %v747_v0 = vshll.u32 %v2471_v28, %v741_v17 }
  0x8b   :  { %v753_v57 = vshll.u32 %v2473_v32, %v741_v17  ;;  %vm471_vm14 = vcmp.eq.s32.totalorder %v2846_v20, 0  ;;  %v745_v33 = vshrl.u32 %v2471_v28, %v742_v47  ;;  %v748_v59 = vshrl.u32 %v2472_v30, %v742_v47 }
  0x8c   :  { %v750_v46 = vshll.u32 %v2472_v30, %v741_v17  ;;  %v751_v58 = vshrl.u32 %v2473_v32, %v742_v47  ;;  %v2879_v60 = vmul.f32 %v2712_v19, %v266_v45  ;;  %vm470_vm15 = vcmp.lt.s32.totalorder %v2846_v20, 2 }
  0x8d   :  { %v571_v61 = vshrl.u32 %v570_v51, 30  ;;  %v740_v55 = vshrl.u32 %v739_v25, 5  ;;  %v754_v29 = vshrl.u32 %v2474_v34, %v742_v47  ;;  %v374_v39 = vsel %vm364_vm9, nan, %v373_v9 }
  0x8e   :  { %vm468_vm0 = vweird.f32 %v2539_v11  ;;  %v484_v62 = vsub.f32 %v2708_v2, %v2861_v36  ;;  %v734_v5 = vand.u32 8388607, %v727_v38  ;;  %v834_v19 = vand.u32 2139095040, %v2867_v48 }
  0x8f   :  { %v572_v3 = vshll.u32 %v571_v61, 30  ;;  %v755_v13 = vor.u32 %v754_v29, %v753_v57  ;;  %v756_v15 = vshll.u32 %v2474_v34, %v741_v17  ;;  %v757_v6 = vshrl.u32 %v2475_v42, %v742_v47 }
  0x90   :  { %v743_v16 = vshrl.u32 %v2470_v26, %v742_v47  ;;  %v746_v1 = vor.u32 %v745_v33, %v744_v56  ;;  %v749_v18 = vor.u32 %v748_v59, %v747_v0  ;;  %v752_v21 = vor.u32 %v751_v58, %v750_v46 }
  0x91   :  { %v2894_v35 = vsub.s32 %v569_v8, %v572_v3  ;;  %vm759_vm1 = vcmp.lt.s32.totalorder %v740_v55, 1  ;;  %vm761_vm2 = vcmp.lt.s32.totalorder %v740_v55, 3  ;;  %vm762_vm3 = vcmp.lt.s32.totalorder %v740_v55, 4  ;;  %v2896_v22 = vpop.eup %2306 }
  0x92   :  { %v482_v50 = vsub.f32 0.0, %v2879_v60  ;;  %vm511_vm4 = vcmp.lt.s32.totalorder %v2627_v14, 0  ;;  %v735_v54 = vor.u32 8388608, %v734_v5  ;;  %v764_v27 = vsel %vm762_vm3, %v752_v21, 2102212464  ;;  %v2309_v31 = vpop.eup %2308 }
  0x93   :  { %v768_v4 = vsel %vm762_vm3, %v755_v13, 920167782  ;;  %v480_v40 = vmul.f32 14.7, %v374_v39  ;;  %v575_v41 = vsub.s32 0, %v2894_v35  ;;  %v758_v37 = vor.u32 %v757_v6, %v756_v15  ;;  %v2311_v52 = vpop.eup %2310 }
  0x94   :  { %v835_v25 = vshrl.u32 %v834_v19, 23  ;;  %v475_v24 = vxor.u32 2147483648, %v2309_v31  ;;  %vm760_vm5 = vcmp.lt.s32.totalorder %v740_v55, 2  ;;  %v767_v17 = vsel %vm759_vm1, %v746_v1, %v749_v18 }
  0x95   :  { %v769_v45 = vsel %vm761_vm2, %v752_v21, %v768_v4  ;;  %v472_v36 = vxor.u32 2147483648, %v2311_v52  ;;  %v2174_v8 = vmin.u32 %v575_v41, %v2894_v35  ;;  %v763_v9 = vsel %vm759_vm1, %v743_v16, %v746_v1 }
  0x96   :  { %v765_v47 = vsel %vm761_vm2, %v749_v18, %v764_v27  ;;  %v476_v51 = vsel %vm474_vm13, %v475_v24, %v2311_v52  ;;  %vm2912_vm6 = vcmp.le.f32.partialorder %v509_v49, 0.7853982  ;;  %v595_v0 = vsub.s32 4, %v571_v61 }
  0x97   :  { %v771_v57 = vsel %vm759_vm1, %v749_v18, %v752_v21  ;;  %v775_v33 = vshll.u32 %v735_v54, 8  ;;  %v473_v59 = vsel %vm471_vm14, %v2309_v31, %v472_v36  ;;  %v577_v46 = vclz %v2174_v8 }
  0x98   :  { %v770_v58 = vsel %vm760_vm5, %v767_v17, %v769_v45  ;;  %v772_v60 = vsel %vm762_vm3, %v758_v37, 1326507024  ;;  %v477_v29 = vsel %vm470_vm15, %v473_v59, %v476_v51  ;;  %v490_v49 = vmul.f32 %v2896_v22, %v2840_v7 }
  0x99   :  { %v565_v39 = vadd.s32 %v2832_v12, %v2827_v10  ;;  %v766_v5 = vsel %vm760_vm5, %v763_v9, %v765_v47  ;;  %v478_v19 = vsel %vm468_vm0, nan, %v477_v29  ;;  %v2175_v3 = vadd.s32 4294967294, %v577_v46 }
  0x9a   :  { %v773_v15 = vsel %vm761_vm2, %v755_v13, %v772_v60  ;;  %v2185_v6 = vadd.s32 4294967169, %v835_v25  ;;  %v479_v16 = vmul.f32 4.9, %v478_v19  ;;  %v596_v7 = vsel %vm511_vm4, %v595_v0, %v571_v61 }
  0x9b   :  { %v774_v1 = vsel %vm760_vm5, %v771_v57, %v773_v15  ;;  %v2932_v20 = vmul.u32.u64.low %v775_v33, %v770_v58  ;;  %v2933_v18 = vmul.u32.u64.high %v775_v33, %v770_v58, %v2932_v20  ;;  %vm2176_vm7 = vcmp.lt.s32.totalorder %v2175_v3, 0 }
  0x9c   :  { %v2937_v10 = vmul.u32.u64.low %v775_v33, %v774_v1  ;;  %v2938_v12 = vmul.u32.u64.high %v775_v33, %v774_v1, %v2937_v10  ;;  %v481_v21 = vadd.f32 %v480_v40, %v479_v16  ;;  %v485_v11 = vsub.f32 %v484_v62, %v479_v16 }
  0x9d   :  { %v580_v54 = vsel %vm2176_vm7, 0, %v2175_v3  ;;  %v841_v27 = vadd.s32 1, %v2185_v6  ;;  %v782_v55 = vmul.u32 %v775_v33, %v766_v5  ;;  %v491_v37 = vsub.f32 2.0, %v490_v49 }
  0x9e   :  { %v581_v4 = vsub.s32 32, %v580_v54  ;;  %v582_v13 = vshll.u32 %v2894_v35, %v580_v54  ;;  %v585_v31 = vsub.s32 4294967266, %v580_v54  ;;  %v483_v41 = vsub.f32 %v482_v50, %v481_v21 }
  0x9f   :  { %v785_v25 = vadd.s32 1, %v2933_v18  ;;  %v831_v52 = vand.u32 2147483647, %v2867_v48  ;;  %v598_v17 = vsel %vm2912_vm6, 0, %v596_v7  ;;  %vm784_vm8 = vc.u32 %v2938_v12, %v2932_v20 }
  0xa0   :  { %v583_v24 = vshrl.u32 %v565_v39, %v581_v4  ;;  %v586_v61 = vadd.s32 127, %v585_v31  ;;  %v497_v62 = vmul.f32 %v485_v11, %v2792_v43  ;;  %v498_v40 = vmul.f32 %v483_v41, %v2794_v44 }
  0xa1   :  { %v786_v35 = vsel %vm784_vm8, %v785_v25, %v2933_v18  ;;  %vm842_vm9 = vcmp.gt.s32.totalorder %v841_v27, 0  ;;  %v705_v9 = vadd.s32 3, %v598_v17  ;;  %v492_v33 = vmul.f32 %v2896_v22, %v491_v37 }
  0xa2   :  { %v584_v50 = vor.u32 %v583_v24, %v582_v13  ;;  %v587_v45 = vshll.u32 %v586_v61, 23  ;;  %v787_v36 = vadd.s32 %v786_v35, %v782_v55  ;;  %v843_v8 = vsel %vm842_vm9, %v841_v27, 0 }
  0xa3   :  { %v845_v47 = vand.u32 31, %v843_v8  ;;  %v499_v59 = vsub.f32 %v497_v62, %v498_v40  ;;  %v838_v43 = vand.u32 8388607, %v831_v52  ;;  %v493_v29 = vmul.f32 1.05, %v483_v41 }
  0xa4   :  { %v588_v51 = vor.u32 4788187, %v587_v45  ;;  %v591_v0 = vcvt.s32.f32 %v584_v50  ;;  %v788_v57 = vadd.s32 536870912, %v787_v36  ;;  %v494_v49 = vmul.f32 %v485_v11, %v2794_v44 }
  0xa5   :  { %v846_v46 = vsub.s32 32, %v845_v47  ;;  %v2955_v39 = vand.u32 3, %v598_v17  ;;  %v2957_v5 = vand.u32 3, %v705_v9  ;;  %v848_v22 = vshll.u32 %v2470_v26, %v845_v47 }
  0xa6   :  { %v589_v58 = vand.u32 2147483647, %v588_v51  ;;  %v2952_v60 = vshrl.u32 %v788_v57, 30  ;;  %v2962_v6 = vmul.f32 %v499_v59, %v492_v33  ;;  %v839_v16 = vor.u32 8388608, %v838_v43 }
  0xa7   :  { %v849_v15 = vshrl.u32 %v2471_v28, %v846_v46  ;;  %v851_v1 = vshll.u32 %v2471_v28, %v845_v47  ;;  %v852_v18 = vshrl.u32 %v2472_v30, %v846_v46  ;;  %v854_v10 = vshll.u32 %v2472_v30, %v845_v47 }
  0xa8   :  { %v592_v19 = vmul.f32 %v591_v0, %v589_v58  ;;  %v790_v3 = vshll.u32 %v2952_v60, 30  ;;  %v855_v21 = vshrl.u32 %v2473_v32, %v846_v46  ;;  %v495_v11 = vsub.f32 %v493_v29, %v494_v49 }
  0xa9   :  { %v783_v54 = vadd.s32 %v2932_v20, %v2938_v12  ;;  %v844_v27 = vshrl.u32 %v843_v8, 5  ;;  %v857_v4 = vshll.u32 %v2473_v32, %v845_v47  ;;  %v850_v55 = vor.u32 %v849_v15, %v848_v22 }
  0xaa   :  { %v593_v7 = vxor.u32 2147483648, %v592_v19  ;;  %v2966_v44 = vsub.s32 %v787_v36, %v790_v3  ;;  %v858_v41 = vshrl.u32 %v2474_v34, %v846_v46  ;;  %v853_v25 = vor.u32 %v852_v18, %v851_v1 }
  0xab   :  { %v860_v24 = vshll.u32 %v2474_v34, %v845_v47  ;;  %v861_v20 = vshrl.u32 %v2475_v42, %v846_v46  ;;  %v507_v12 = vmul.f32 0.025, %v2962_v6  ;;  %v856_v17 = vor.u32 %v855_v21, %v854_v10 }
  0xac   :  { %v594_v13 = vsel %vm511_vm4, %v593_v7, %v592_v19  ;;  %v793_v31 = vsub.s32 0, %v2966_v44  ;;  %v847_v62 = vshrl.u32 %v2470_v26, %v846_v46  ;;  %v859_v40 = vor.u32 %v858_v41, %v857_v4 }
  0xad   :  { %v597_v37 = vsel %vm2912_vm6, %v2627_v14, %v594_v13  ;;  %v862_v35 = vor.u32 %v861_v20, %v860_v24  ;;  %vm863_vm10 = vcmp.lt.s32.totalorder %v844_v27, 1  ;;  %vm865_vm11 = vcmp.lt.s32.totalorder %v844_v27, 3 }
  0xae   :  { %2312 = vcosq.f32 %v597_v37  ;;  %v2182_v61 = vmin.u32 %v793_v31, %v2966_v44  ;;  %v879_v56 = vshll.u32 %v839_v16, 8  ;;  %v2984_v45 = vmul.f32 %v495_v11, %v492_v33 }
  0xaf   :  { %2314 = vsinq.f32 %v597_v37  ;;  %vm604_vm12 = vcmp.eq.s32.totalorder %v2955_v39, 0  ;;  %vm864_vm13 = vcmp.lt.s32.totalorder %v844_v27, 2  ;;  %vm866_vm14 = vcmp.lt.s32.totalorder %v844_v27, 4 }
  0xb0   :  { %v795_v50 = vclz %v2182_v61  ;;  %v871_v36 = vsel %vm863_vm10, %v850_v55, %v853_v25  ;;  %vm603_vm15 = vcmp.lt.s32.totalorder %v2955_v39, 2  ;;  %v868_v9 = vsel %vm866_vm14, %v856_v17, 2102212464 }
  0xb1   :  { %v872_v47 = vsel %vm866_vm14, %v859_v40, 920167782  ;;  %v875_v51 = vsel %vm863_vm10, %v853_v25, %v856_v17  ;;  %v2989_v0 = vadd.f32 %v507_v12, %v2602_v53  ;;  %vm601_vm0 = vweird.f32 %v2627_v14 }
  0xb2   :  { %v2183_v8 = vadd.s32 4294967294, %v795_v50  ;;  %v867_v57 = vsel %vm863_vm10, %v847_v62, %v850_v55  ;;  %v873_v33 = vsel %vm865_vm11, %v856_v17, %v872_v47  ;;  %v876_v59 = vsel %vm866_vm14, %v862_v35, 1326507024 }
  0xb3   :  { %v869_v43 = vsel %vm865_vm11, %v853_v25, %v868_v9  ;;  %v874_v46 = vsel %vm864_vm13, %v871_v36, %v873_v33  ;;  %v877_v58 = vsel %vm865_vm11, %v859_v40, %v876_v59  ;;  %vm607_vm2 = vcmp.eq.s32.totalorder %v2955_v39, 2 }
  0xb4   :  { %vm2184_vm1 = vcmp.lt.s32.totalorder %v2183_v8, 0  ;;  %v878_v49 = vsel %vm864_vm13, %v875_v51, %v877_v58  ;;  %v2997_v19 = vmul.u32.u64.low %v879_v56, %v874_v46  ;;  %v2998_v3 = vmul.u32.u64.high %v879_v56, %v874_v46, %v2997_v19 }
  0xb5   :  { %v798_v29 = vsel %vm2184_vm1, 0, %v2183_v8  ;;  %v870_v16 = vsel %vm864_vm13, %v867_v57, %v869_v43  ;;  %v3004_v1 = vmul.u32.u64.low %v879_v56, %v878_v49  ;;  %v3005_v18 = vmul.u32.u64.high %v879_v56, %v878_v49, %v3004_v1 }
  0xb6   :  { %v799_v53 = vsub.s32 32, %v798_v29  ;;  %v800_v22 = vshll.u32 %v2966_v44, %v798_v29  ;;  %v803_v15 = vsub.s32 4294967266, %v798_v29  ;;  %v958_v7 = vmul.f32 0.025, %v2989_v0 }
  0xb7   :  { %vm707_vm3 = vcmp.lt.s32.totalorder %v2957_v5, 2  ;;  %vm711_vm4 = vcmp.eq.s32.totalorder %v2957_v5, 2  ;;  %v505_v13 = vmul.f32 0.025, %v2984_v45  ;;  %vm708_vm5 = vcmp.eq.s32.totalorder %v2957_v5, 0 }
  0xb8   :  { %v2313_v10 = vpop.eup %2312  ;;  %v801_v21 = vshrl.u32 %v783_v54, %v799_v53  ;;  %v804_v11 = vadd.s32 127, %v803_v15  ;;  %v889_v44 = vadd.s32 1, %v2998_v3  ;;  %v886_v37 = vmul.u32 %v879_v56, %v870_v16  ;;  %v3017_v54 = vld [vmem:[#allocation2 + $0x8] sm:$0xff] }
  0xb9   :  { %v2315_v4 = vpop.eup %2314  ;;  %v608_v31 = vxor.u32 2147483648, %v2313_v10  ;;  %vm888_vm6 = vc.u32 %v3005_v18, %v2997_v19  ;;  %v3020_v20 = vadd.f32 %v3017_v54, %v958_v7  ;;  %v3032_v9 = vadd.f32 %v505_v13, %v2615_v63 }
  0xba   :  { %v605_v27 = vxor.u32 2147483648, %v2315_v4  ;;  %v802_v55 = vor.u32 %v801_v21, %v800_v22  ;;  %v805_v41 = vshll.u32 %v804_v11, 23  ;;  %v890_v35 = vsel %vm888_vm6, %v889_v44, %v2998_v3 }
  0xbb   :  { %v609_v25 = vsel %vm607_vm2, %v608_v31, %v2315_v4  ;;  %v713_v24 = vsel %vm711_vm4, %v608_v31, %v2315_v4  ;;  %v891_v8 = vadd.s32 %v890_v35, %v886_v37  ;;  %v967_v57 = vand.u32 2139095040, %v3020_v20 }
  0xbc   :  { %v606_v12 = vsel %vm604_vm12, %v2313_v10, %v605_v27  ;;  %v710_v61 = vsel %vm708_vm5, %v2313_v10, %v605_v27  ;;  %v806_v17 = vor.u32 4788187, %v805_v41  ;;  %v809_v62 = vcvt.s32.f32 %v802_v55 }
  0xbd   :  { %v610_v40 = vsel %vm603_vm15, %v606_v12, %v609_v25  ;;  %v714_v56 = vsel %vm707_vm3, %v710_v61, %v713_v24  ;;  %v892_v51 = vadd.s32 536870912, %v891_v8  ;;  %v813_v59 = vsub.s32 4, %v2952_v60 }
  0xbe   :  { %v611_v50 = vsel %vm601_vm0, nan, %v610_v40  ;;  %v807_v36 = vand.u32 2147483647, %v806_v17  ;;  %v715_v39 = vsel %vm601_vm0, nan, %v714_v56  ;;  %v968_v46 = vshrl.u32 %v967_v57, 23 }
  0xbf   :  { %v717_v33 = vmul.f32 0.5, %v611_v50  ;;  %v893_v43 = vshrl.u32 %v892_v51, 30  ;;  %vm729_vm7 = vcmp.lt.s32.totalorder %v2724_v23, 0  ;;  %v719_v58 = vmul.f32 0.5, %v715_v39 }
  0xc0   :  { %v810_v47 = vmul.f32 %v809_v62, %v807_v36  ;;  %v956_v63 = vmul.f32 0.025, %v3032_v9  ;;  %v2189_v49 = vadd.s32 4294967169, %v968_v46  ;;  %v3040_v3 = vadd.f32 2.5, %v611_v50 }
  0xc1   :  { %v894_v29 = vshll.u32 %v893_v43, 30  ;;  %v3042_v53 = vadd.f32 1.05, %v717_v33  ;;  %v814_v14 = vsel %vm729_vm7, %v813_v59, %v2952_v60  ;;  %vm3047_vm8 = vcmp.le.f32.partialorder %v727_v38, 0.7853982  ;;  %v3059_v38 = vld [vmem:[#allocation2] sm:$0xff] }
  0xc2   :  { %v811_v5 = vxor.u32 2147483648, %v810_v47  ;;  %v964_v16 = vand.u32 2147483647, %v3020_v20  ;;  %v722_v1 = vmul.f32 2.0, %v3032_v9  ;;  %vm833_vm9 = vcmp.lt.s32.totalorder %v2867_v48, 0 }
  0xc3   :  { %v3051_v15 = vsub.s32 %v891_v8, %v894_v29  ;;  %v974_v10 = vadd.s32 1, %v2189_v49  ;;  %v720_v21 = vsub.f32 0.0, %v719_v58  ;;  %v816_v60 = vsel %vm3047_vm8, 0, %v814_v14 }
  0xc4   :  { %v812_v7 = vsel %vm729_vm7, %v811_v5, %v810_v47  ;;  %v3062_v4 = vadd.f32 %v3059_v38, %v956_v63  ;;  %v917_v13 = vsub.s32 4, %v893_v43  ;;  %v941_v31 = vmul.f32 1.05, %v3040_v3 }
  0xc5   :  { %v897_v11 = vsub.s32 0, %v3051_v15  ;;  %v942_v44 = vmul.f32 %v3042_v53, %v3042_v53  ;;  %vm975_vm10 = vcmp.gt.s32.totalorder %v974_v10, 0  ;;  %v815_v27 = vsel %vm3047_vm8, %v2724_v23, %v812_v7 }
  0xc6   :  { %vm3072_vm11 = vcmp.le.f32.partialorder %v831_v52, 0.7853982  ;;  %v971_v37 = vand.u32 8388607, %v964_v16  ;;  %v3080_v25 = vadd.f32 %v722_v1, %v2989_v0  ;;  %v3082_v24 = vand.u32 3, %v816_v60 }
  0xc7   :  { %v2186_v41 = vmin.u32 %v897_v11, %v3051_v15  ;;  %v976_v12 = vsel %vm975_vm10, %v974_v10, 0  ;;  %v1182_v61 = vand.u32 2147483647, %v3062_v4  ;;  %v3086_v17 = vmul.f32 %v719_v58, %v3032_v9 }
  0xc8   :  { %v887_v52 = vadd.s32 %v2997_v19, %v3005_v18  ;;  %v978_v40 = vand.u32 31, %v976_v12  ;;  %v3091_v35 = vmul.f32 %v720_v21, %v2989_v0  ;;  %2316 = vcosq.f32 %v815_v27 }
  0xc9   :  { %v899_v62 = vclz %v2186_v41  ;;  %v3095_v50 = vsel %vm833_vm9, %v917_v13, %v893_v43  ;;  %v3097_v56 = vsub.f32 %v941_v31, %v942_v44  ;;  %2318 = vsinq.f32 %v815_v27 }
  0xca   :  { %v972_v8 = vor.u32 8388608, %v971_v37  ;;  %v979_v47 = vsub.s32 32, %v978_v40  ;;  %v981_v51 = vshll.u32 %v2470_v26, %v978_v40  ;;  %v984_v19 = vshll.u32 %v2471_v28, %v978_v40 }
  0xcb   :  { %v2187_v36 = vadd.s32 4294967294, %v899_v62  ;;  %v1185_v18 = vand.u32 2139095040, %v3062_v4  ;;  %v3104_v57 = vand.u32 8388607, %v1182_v61  ;;  %v987_v33 = vshll.u32 %v2472_v30, %v978_v40 }
  0xcc   :  { %v982_v39 = vshrl.u32 %v2471_v28, %v979_v47  ;;  %v990_v59 = vshll.u32 %v2473_v32, %v978_v40  ;;  %v985_v46 = vshrl.u32 %v2472_v30, %v979_v47  ;;  %v988_v5 = vshrl.u32 %v2473_v32, %v979_v47 }
  0xcd   :  { %vm2188_vm12 = vcmp.lt.s32.totalorder %v2187_v36, 0  ;;  %v991_v58 = vshrl.u32 %v2474_v34, %v979_v47  ;;  %v977_v14 = vshrl.u32 %v976_v12, 5  ;;  %v920_v22 = vsel %vm3072_vm11, 0, %v3095_v50 }
  0xce   :  { %v902_v43 = vsel %vm2188_vm12, 0, %v2187_v36  ;;  %v993_v1 = vshll.u32 %v2474_v34, %v978_v40  ;;  %v3117_v7 = vshll.u32 %v972_v8, 8  ;;  %v1186_v10 = vshrl.u32 %v1185_v18, 23 }
  0xcf   :  { %v903_v29 = vsub.s32 32, %v902_v43  ;;  %v904_v63 = vshll.u32 %v3051_v15, %v902_v43  ;;  %v907_v49 = vsub.s32 4294967266, %v902_v43  ;;  %v980_v11 = vshrl.u32 %v2470_v26, %v979_v47 }
  0xd0   :  { %v983_v13 = vor.u32 %v982_v39, %v981_v51  ;;  %v986_v31 = vor.u32 %v985_v46, %v984_v19  ;;  %v989_v44 = vor.u32 %v988_v5, %v987_v33  ;;  %v992_v27 = vor.u32 %v991_v58, %v990_v59 }
  0xd1   :  { %v905_v21 = vshrl.u32 %v887_v52, %v903_v29  ;;  %v908_v60 = vadd.s32 127, %v907_v49  ;;  %v994_v15 = vshrl.u32 %v2475_v42, %v979_v47  ;;  %vm996_vm13 = vcmp.lt.s32.totalorder %v977_v14, 1 }
  0xd2   :  { %v1190_v12 = vor.u32 8388608, %v3104_v57  ;;  %v3122_v62 = vpop.eup %2316  ;;  %vm997_vm14 = vcmp.lt.s32.totalorder %v977_v14, 2  ;;  %vm998_vm15 = vcmp.lt.s32.totalorder %v977_v14, 3  ;;  %v2197_v52 = vadd.s32 4294967169, %v1186_v10 }
  0xd3   :  { %v906_v41 = vor.u32 %v905_v21, %v904_v63  ;;  %v909_v37 = vshll.u32 %v908_v60, 23  ;;  %v995_v40 = vor.u32 %v994_v15, %v993_v1  ;;  %v3124_v50 = vpop.eup %2318  ;;  %vm825_vm0 = vcmp.eq.s32.totalorder %v3082_v24, 2 }
  0xd4   :  { %vm999_vm1 = vcmp.lt.s32.totalorder %v977_v14, 4  ;;  %v1000_v47 = vsel %vm996_vm13, %v980_v11, %v983_v13  ;;  %v1004_v19 = vsel %vm996_vm13, %v983_v13, %v986_v31  ;;  %v1008_v57 = vsel %vm996_vm13, %v986_v31, %v989_v44 }
  0xd5   :  { %v910_v36 = vor.u32 4788187, %v909_v37  ;;  %v913_v8 = vcvt.s32.f32 %v906_v41  ;;  %v1001_v51 = vsel %vm999_vm1, %v989_v44, 2102212464  ;;  %v1005_v18 = vsel %vm999_vm1, %v992_v27, 920167782 }
  0xd6   :  { %v1002_v33 = vsel %vm998_vm15, %v986_v31, %v1001_v51  ;;  %v1006_v59 = vsel %vm998_vm15, %v989_v44, %v1005_v18  ;;  %v1009_v43 = vsel %vm999_vm1, %v995_v40, 1326507024  ;;  %v1192_v29 = vadd.s32 1, %v2197_v52 }
  0xd7   :  { %v911_v39 = vand.u32 2147483647, %v910_v36  ;;  %v1003_v46 = vsel %vm997_vm14, %v1000_v47, %v1002_v33  ;;  %v1007_v5 = vsel %vm997_vm14, %v1004_v19, %v1006_v59  ;;  %v1010_v58 = vsel %vm998_vm15, %v992_v27, %v1009_v43 }
  0xd8   :  { %vm822_vm2 = vcmp.eq.s32.totalorder %v3082_v24, 0  ;;  %v1011_v49 = vsel %vm997_vm14, %v1008_v57, %v1010_v58  ;;  %v3138_v1 = vmul.u32.u64.low %v3117_v7, %v1007_v5  ;;  %v3139_v10 = vmul.u32.u64.high %v3117_v7, %v1007_v5, %v3138_v1 }
  0xd9   :  { %v914_v63 = vmul.f32 %v913_v8, %v911_v39  ;;  %v3144_v21 = vmul.f32 %v3086_v17, %v3032_v9  ;;  %v3147_v60 = vmul.u32.u64.low %v3117_v7, %v1011_v49  ;;  %v3148_v11 = vmul.u32.u64.high %v3117_v7, %v1011_v49, %v3147_v60 }
  0xda   :  { %vm1193_vm3 = vcmp.gt.s32.totalorder %v1192_v29, 0  ;;  %v3150_v31 = vand.u32 3, %v920_v22  ;;  %2320 = vrcp.f32 %v3097_v56  ;;  %vm821_vm4 = vcmp.lt.s32.totalorder %v3082_v24, 2 }
  0xdb   :  { %v915_v13 = vxor.u32 2147483648, %v914_v63  ;;  %v1194_v14 = vsel %vm1193_vm3, %v1192_v29, 0  ;;  %v826_v44 = vxor.u32 2147483648, %v3122_v62  ;;  %v1019_v27 = vmul.u32 %v3117_v7, %v1003_v46 }
  0xdc   :  { %v1196_v15 = vand.u32 31, %v1194_v14  ;;  %v3158_v17 = vadd.f32 %v3020_v20, %v3062_v4  ;;  %v823_v41 = vxor.u32 2147483648, %v3124_v50  ;;  %v1022_v37 = vadd.s32 1, %v3139_v10 }
  0xdd   :  { %v916_v22 = vsel %vm833_vm9, %v915_v13, %v914_v63  ;;  %v3164_v40 = vshll.u32 %v1190_v12, 8  ;;  %vm1021_vm5 = vc.u32 %v3148_v11, %v3138_v1  ;;  %v3171_v7 = vshrl.u32 %v1194_v14, 5 }
  0xde   :  { %v919_v52 = vsel %vm3072_vm11, %v2867_v48, %v916_v22  ;;  %v1197_v36 = vsub.s32 32, %v1196_v15  ;;  %vm819_vm6 = vweird.f32 %v2724_v23  ;;  %v1023_v8 = vsel %vm1021_vm5, %v1022_v37, %v3139_v10 }
  0xdf   :  { %2322 = vcosq.f32 %v919_v52  ;;  %v1199_v47 = vshll.u32 %v2470_v26, %v1196_v15  ;;  %v1202_v12 = vshll.u32 %v2471_v28, %v1196_v15  ;;  %v827_v55 = vsel %vm825_vm0, %v826_v44, %v3124_v50 }
  0xe0   :  { %2324 = vsinq.f32 %v919_v52  ;;  %v1024_v51 = vadd.s32 %v1023_v8, %v1019_v27  ;;  %v1200_v19 = vshrl.u32 %v2471_v28, %v1197_v36  ;;  %v1203_v18 = vshrl.u32 %v2472_v30, %v1197_v36 }
  0xe1   :  { %v1205_v57 = vshll.u32 %v2472_v30, %v1196_v15  ;;  %v1206_v39 = vshrl.u32 %v2473_v32, %v1197_v36  ;;  %v1208_v33 = vshll.u32 %v2473_v32, %v1196_v15  ;;  %v1209_v46 = vshrl.u32 %v2474_v34, %v1197_v36 }
  0xe2   :  { %v1025_v59 = vadd.s32 536870912, %v1024_v51  ;;  %v1201_v43 = vor.u32 %v1200_v19, %v1199_v47  ;;  %v1211_v5 = vshll.u32 %v2474_v34, %v1196_v15  ;;  %v1204_v58 = vor.u32 %v1203_v18, %v1202_v12 }
  0xe3   :  { %v1207_v50 = vor.u32 %v1206_v39, %v1205_v57  ;;  %v1212_v29 = vshrl.u32 %v2475_v42, %v1197_v36  ;;  %vm1214_vm7 = vcmp.lt.s32.totalorder %v3171_v7, 1  ;;  %v824_v63 = vsel %vm822_vm2, %v3122_v62, %v823_v41 }
  0xe4   :  { %vm923_vm8 = vweird.f32 %v2867_v48  ;;  %v3193_v49 = vshrl.u32 %v1025_v59, 30  ;;  %v1210_v10 = vor.u32 %v1209_v46, %v1208_v33  ;;  %vm1216_vm9 = vcmp.lt.s32.totalorder %v3171_v7, 3  ;;  %v3196_v60 = vpop.eup %2320 }
  0xe5   :  { %v1213_v13 = vor.u32 %v1212_v29, %v1211_v5  ;;  %vm1215_vm10 = vcmp.lt.s32.totalorder %v3171_v7, 2  ;;  %vm1217_vm11 = vcmp.lt.s32.totalorder %v3171_v7, 4  ;;  %v1222_v14 = vsel %vm1214_vm7, %v1201_v43, %v1204_v58 }
  0xe6   :  { %v724_v62 = vmul.f32 %v3080_v25, %v3091_v35  ;;  %vm929_vm12 = vcmp.eq.s32.totalorder %v3150_v31, 2  ;;  %v1027_v44 = vshll.u32 %v3193_v49, 30  ;;  %v1223_v27 = vsel %vm1217_vm11, %v1210_v10, 920167782 }
  0xe7   :  { %v828_v15 = vsel %vm821_vm4, %v824_v63, %v827_v55  ;;  %v1198_v41 = vshrl.u32 %v2470_v26, %v1197_v36  ;;  %v1224_v22 = vsel %vm1216_vm9, %v1207_v50, %v1223_v27  ;;  %v1227_v37 = vsel %vm1217_vm11, %v1213_v13, 1326507024 }
  0xe8   :  { %v3211_v52 = vsub.s32 %v1024_v51, %v1027_v44  ;;  %v1225_v8 = vsel %vm1215_vm10, %v1222_v14, %v1224_v22  ;;  %v1226_v25 = vsel %vm1214_vm7, %v1204_v58, %v1207_v50  ;;  %v1289_v35 = vand.u32 2139095040, %v3158_v17 }
  0xe9   :  { %v2323_v47 = vpop.eup %2322  ;;  %v1219_v12 = vsel %vm1217_vm11, %v1207_v50, 2102212464  ;;  %v1228_v24 = vsel %vm1216_vm9, %v1210_v10, %v1227_v37  ;;  %v3221_v36 = vmul.u32.u64.low %v3164_v40, %v1225_v8  ;;  %v3222_v55 = vmul.u32.u64.high %v3164_v40, %v1225_v8, %v3221_v36 }
  0xea   :  { %v2325_v51 = vpop.eup %2324  ;;  %v829_v19 = vsel %vm819_vm6, nan, %v828_v15  ;;  %vm926_vm13 = vcmp.eq.s32.totalorder %v3150_v31, 0  ;;  %v930_v18 = vxor.u32 2147483648, %v2323_v47  ;;  %v1030_v57 = vsub.s32 0, %v3211_v52 }
  0xeb   :  { %vm925_vm14 = vcmp.lt.s32.totalorder %v3150_v31, 2  ;;  %v927_v39 = vxor.u32 2147483648, %v2325_v51  ;;  %v1218_v33 = vsel %vm1214_vm7, %v1198_v41, %v1201_v43  ;;  %v1229_v59 = vsel %vm1215_vm10, %v1226_v25, %v1228_v24 }
  0xec   :  { %v931_v46 = vsel %vm929_vm12, %v930_v18, %v2325_v51  ;;  %v2190_v23 = vmin.u32 %v1030_v57, %v3211_v52  ;;  %v1220_v5 = vsel %vm1216_vm9, %v1204_v58, %v1219_v12  ;;  %v1290_v50 = vshrl.u32 %v1289_v35, 23 }
  0xed   :  { %v928_v29 = vsel %vm926_vm13, %v2323_v47, %v927_v39  ;;  %v935_v63 = vmul.f32 14.7, %v829_v19  ;;  %v939_v10 = vsub.f32 %v2708_v2, %v3144_v21  ;;  %v937_v27 = vsub.f32 0.0, %v724_v62 }
  0xee   :  { %v932_v13 = vsel %vm925_vm14, %v928_v29, %v931_v46  ;;  %v1032_v14 = vclz %v2190_v23  ;;  %v3242_v43 = vmul.u32.u64.low %v3164_v40, %v1229_v59  ;;  %v3243_v44 = vmul.u32.u64.high %v3164_v40, %v1229_v59, %v3242_v43 }
  0xef   :  { %v933_v31 = vsel %vm923_vm8, nan, %v932_v13  ;;  %v945_v15 = vmul.f32 %v3196_v60, %v3097_v56  ;;  %v1221_v58 = vsel %vm1215_vm10, %v1218_v33, %v1220_v5  ;;  %v1050_v21 = vsub.s32 4, %v3193_v49 }
  0xf0   :  { %v934_v41 = vmul.f32 4.9, %v933_v31  ;;  %v2191_v22 = vadd.s32 4294967294, %v1032_v14  ;;  %v2201_v37 = vadd.s32 4294967169, %v1290_v50  ;;  %vm966_vm15 = vcmp.lt.s32.totalorder %v3020_v20, 0 }
  0xf1   :  { %v1020_v8 = vadd.s32 %v3138_v1, %v3148_v11  ;;  %v1240_v48 = vadd.s32 1, %v3222_v55  ;;  %v1237_v56 = vmul.u32 %v3164_v40, %v1221_v58  ;;  %vm1239_vm1 = vc.u32 %v3243_v44, %v3221_v36 }
  0xf2   :  { %v936_v25 = vadd.f32 %v935_v63, %v934_v41  ;;  %v940_v62 = vsub.f32 %v939_v10, %v934_v41  ;;  %vm2192_vm0 = vcmp.lt.s32.totalorder %v2191_v22, 0  ;;  %v1286_v7 = vand.u32 2147483647, %v3158_v17 }
  0xf3   :  { %v1035_v35 = vsel %vm2192_vm0, 0, %v2191_v22  ;;  %v1296_v47 = vadd.s32 1, %v2201_v37  ;;  %v946_v24 = vsub.f32 2.0, %v945_v15  ;;  %v1051_v1 = vsel %vm966_vm15, %v1050_v21, %v3193_v49 }
  0xf4   :  { %v938_v12 = vsub.f32 %v937_v27, %v936_v25  ;;  %v1036_v51 = vsub.s32 32, %v1035_v35  ;;  %v1037_v11 = vshll.u32 %v3211_v52, %v1035_v35  ;;  %v1040_v19 = vsub.s32 4294967266, %v1035_v35 }
  0xf5   :  { %v1241_v18 = vsel %vm1239_vm1, %v1240_v48, %v3222_v55  ;;  %vm1297_vm2 = vcmp.gt.s32.totalorder %v1296_v47, 0  ;;  %v952_v40 = vmul.f32 %v940_v62, %v3040_v3  ;;  %vm3269_vm3 = vcmp.le.f32.partialorder %v964_v16, 0.7853982 }
  0xf6   :  { %v953_v57 = vmul.f32 %v938_v12, %v3042_v53  ;;  %v1038_v39 = vshrl.u32 %v1020_v8, %v1036_v51  ;;  %v1242_v33 = vadd.s32 %v1241_v18, %v1237_v56  ;;  %v1041_v46 = vadd.s32 127, %v1040_v19 }
  0xf7   :  { %v1293_v49 = vand.u32 8388607, %v1286_v7  ;;  %v1298_v52 = vsel %vm1297_vm2, %v1296_v47, 0  ;;  %v1053_v55 = vsel %vm3269_vm3, 0, %v1051_v1  ;;  %v3278_v63 = vmul.f32 %v3196_v60, %v946_v24 }
  0xf8   :  { %v1039_v23 = vor.u32 %v1038_v39, %v1037_v11  ;;  %v1243_v3 = vadd.s32 536870912, %v1242_v33  ;;  %v1042_v5 = vshll.u32 %v1041_v46, 23  ;;  %v1160_v50 = vadd.s32 3, %v1053_v55 }
  0xf9   :  { %v1300_v29 = vand.u32 31, %v1298_v52  ;;  %v954_v16 = vsub.f32 %v952_v40, %v953_v57  ;;  %v1294_v43 = vor.u32 8388608, %v1293_v49  ;;  %v3282_v27 = vmul.f32 1.05, %v938_v12 }
  0xfa   :  { %v3280_v10 = vshrl.u32 %v1243_v3, 30  ;;  %v1043_v13 = vor.u32 4788187, %v1042_v5  ;;  %v1046_v14 = vcvt.s32.f32 %v1039_v23  ;;  %v3285_v15 = vmul.f32 %v940_v62, %v3042_v53 }
  0xfb   :  { %v1301_v31 = vsub.s32 32, %v1300_v29  ;;  %v3288_v22 = vand.u32 3, %v1053_v55  ;;  %v3290_v21 = vand.u32 3, %v1160_v50  ;;  %v1238_v60 = vadd.s32 %v3221_v36, %v3243_v44 }
  0xfc   :  { %v1245_v58 = vshll.u32 %v3280_v10, 30  ;;  %v1044_v41 = vand.u32 2147483647, %v1043_v13  ;;  %v3295_v37 = vmul.f32 %v954_v16, %v3278_v63  ;;  %v1303_v48 = vshll.u32 %v2470_v26, %v1300_v29 }
  0xfd   :  { %v1304_v53 = vshrl.u32 %v2471_v28, %v1301_v31  ;;  %v1306_v62 = vshll.u32 %v2471_v28, %v1300_v29  ;;  %v1307_v56 = vshrl.u32 %v2472_v30, %v1301_v31  ;;  %v3303_v35 = vshll.u32 %v1294_v43, 8 }
  0xfe   :  { %v3297_v8 = vsub.s32 %v1242_v33, %v1245_v58  ;;  %v1047_v25 = vmul.f32 %v1046_v14, %v1044_v41  ;;  %v950_v47 = vsub.f32 %v3282_v27, %v3285_v15  ;;  %v1299_v44 = vshrl.u32 %v1298_v52, 5  ;;  %v3324_v41 = vld [vmem:[#allocation2 + $0x18] sm:$0xff] }
  0xff   :  { %v1309_v12 = vshll.u32 %v2472_v30, %v1300_v29  ;;  %v1310_v51 = vshrl.u32 %v2473_v32, %v1301_v31  ;;  %v1312_v1 = vshll.u32 %v2473_v32, %v1300_v29  ;;  %v1313_v11 = vshrl.u32 %v2474_v34, %v1301_v31 }
 0x100   :  { %v1248_v36 = vsub.s32 0, %v3297_v8  ;;  %v1048_v24 = vxor.u32 2147483648, %v1047_v25  ;;  %v962_v19 = vmul.f32 0.025, %v3295_v37  ;;  %v1302_v40 = vshrl.u32 %v2470_v26, %v1301_v31 }
 0x101   :  { %v1305_v57 = vor.u32 %v1304_v53, %v1303_v48  ;;  %v1308_v33 = vor.u32 %v1307_v56, %v1306_v62  ;;  %v1311_v46 = vor.u32 %v1310_v51, %v1309_v12  ;;  %v1314_v49 = vor.u32 %v1313_v11, %v1312_v1 }
 0x102   :  { %v2198_v18 = vmin.u32 %v1248_v36, %v3297_v8  ;;  %v1049_v39 = vsel %vm966_vm15, %v1048_v24, %v1047_v25  ;;  %v1315_v55 = vshll.u32 %v2474_v34, %v1300_v29  ;;  %v1316_v3 = vshrl.u32 %v2475_v42, %v1301_v31 }
 0x103   :  { %v1052_v52 = vsel %vm3269_vm3, %v3020_v20, %v1049_v39  ;;  %vm1318_vm4 = vcmp.lt.s32.totalorder %v1299_v44, 1  ;;  %vm1319_vm5 = vcmp.lt.s32.totalorder %v1299_v44, 2  ;;  %vm1320_vm6 = vcmp.lt.s32.totalorder %v1299_v44, 3 }
 0x104   :  { %v1250_v23 = vclz %v2198_v18  ;;  %2326 = vcosq.f32 %v1052_v52  ;;  %v1317_v50 = vor.u32 %v1316_v3, %v1315_v55  ;;  %vm1321_vm7 = vcmp.lt.s32.totalorder %v1299_v44, 4 }
 0x105   :  { %2328 = vsinq.f32 %v1052_v52  ;;  %v1322_v16 = vsel %vm1318_vm4, %v1302_v40, %v1305_v57  ;;  %v1323_v13 = vsel %vm1321_vm7, %v1311_v46, 2102212464  ;;  %v1326_v14 = vsel %vm1318_vm4, %v1305_v57, %v1308_v33 }
 0x106   :  { %v2199_v5 = vadd.s32 4294967294, %v1250_v23  ;;  %v1327_v43 = vsel %vm1321_vm7, %v1314_v49, 920167782  ;;  %v1324_v59 = vsel %vm1320_vm6, %v1308_v33, %v1323_v13  ;;  %v1330_v29 = vsel %vm1318_vm4, %v1308_v33, %v1311_v46 }
 0x107   :  { %v1328_v58 = vsel %vm1320_vm6, %v1311_v46, %v1327_v43  ;;  %v3327_v31 = vadd.f32 %v3324_v41, %v962_v19  ;;  %v1331_v25 = vsel %vm1321_vm7, %v1317_v50, 1326507024  ;;  %v1325_v24 = vsel %vm1319_vm5, %v1322_v16, %v1324_v59 }
 0x108   :  { %vm2200_vm8 = vcmp.lt.s32.totalorder %v2199_v5, 0  ;;  %v1329_v53 = vsel %vm1319_vm5, %v1326_v14, %v1328_v58  ;;  %v1332_v12 = vsel %vm1320_vm6, %v1314_v49, %v1331_v25  ;;  %vm1056_vm9 = vweird.f32 %v3020_v20 }
 0x109   :  { %v1253_v48 = vsel %vm2200_vm8, 0, %v2199_v5  ;;  %v1333_v51 = vsel %vm1319_vm5, %v1330_v29, %v1332_v12  ;;  %v3335_v1 = vmul.u32.u64.low %v3303_v35, %v1329_v53  ;;  %v3336_v11 = vmul.u32.u64.high %v3303_v35, %v1329_v53, %v3335_v1 }
 0x10a   :  { %v1254_v62 = vsub.s32 32, %v1253_v48  ;;  %v1255_v56 = vshll.u32 %v3297_v8, %v1253_v48  ;;  %v1258_v36 = vsub.s32 4294967266, %v1253_v48  ;;  %v1413_v8 = vmul.f32 0.05, %v3327_v31 }
 0x10b   :  { %v3340_v40 = vmul.u32.u64.low %v3303_v35, %v1333_v51  ;;  %v3341_v57 = vmul.u32.u64.high %v3303_v35, %v1333_v51, %v3340_v40  ;;  %vm1059_vm10 = vcmp.eq.s32.totalorder %v3288_v22, 0  ;;  %vm1062_vm11 = vcmp.eq.s32.totalorder %v3288_v22, 2 }
 0x10c   :  { %v1256_v19 = vshrl.u32 %v1238_v60, %v1254_v62  ;;  %v1259_v18 = vadd.s32 127, %v1258_v36  ;;  %vm1163_vm12 = vcmp.eq.s32.totalorder %v3290_v21, 0  ;;  %vm1166_vm13 = vcmp.eq.s32.totalorder %v3290_v21, 2 }
 0x10d   :  { %v1341_v60 = vmul.u32 %v3303_v35, %v1325_v24  ;;  %v1344_v46 = vadd.s32 1, %v3336_v11  ;;  %v3355_v52 = vmul.f32 %v950_v47, %v3278_v63  ;;  %v3358_v3 = vadd.f32 %v3017_v54, %v1413_v8 }
 0x10e   :  { %v1257_v44 = vor.u32 %v1256_v19, %v1255_v56  ;;  %v1260_v39 = vshll.u32 %v1259_v18, 23  ;;  %v2327_v33 = vpop.eup %2326  ;;  %vm1058_vm14 = vcmp.lt.s32.totalorder %v3288_v22, 2  ;;  %vm1343_vm15 = vc.u32 %v3341_v57, %v3335_v1 }
 0x10f   :  { %v2329_v49 = vpop.eup %2328  ;;  %v1063_v23 = vxor.u32 2147483648, %v2327_v33  ;;  %vm1162_vm0 = vcmp.lt.s32.totalorder %v3290_v21, 2  ;;  %v1345_v63 = vsel %vm1343_vm15, %v1344_v46, %v3336_v11  ;;  %v960_v13 = vmul.f32 0.025, %v3355_v52  ;;  %v3379_v21 = vld [vmem:[#allocation2 + $0x10] sm:$0xff] }
 0x110   :  { %v1261_v55 = vor.u32 4788187, %v1260_v39  ;;  %v1060_v5 = vxor.u32 2147483648, %v2329_v49  ;;  %v1264_v50 = vcvt.s32.f32 %v1257_v44  ;;  %v1346_v16 = vadd.s32 %v1345_v63, %v1341_v60 }
 0x111   :  { %v1064_v35 = vsel %vm1062_vm11, %v1063_v23, %v2329_v49  ;;  %v1168_v47 = vsel %vm1166_vm13, %v1063_v23, %v2329_v49  ;;  %v1268_v43 = vsub.s32 4, %v3280_v10  ;;  %v1422_v59 = vand.u32 2139095040, %v3358_v3 }
 0x112   :  { %v1262_v27 = vand.u32 2147483647, %v1261_v55  ;;  %v1061_v15 = vsel %vm1059_vm10, %v2327_v33, %v1060_v5  ;;  %v1165_v54 = vsel %vm1163_vm12, %v2327_v33, %v1060_v5  ;;  %v1347_v29 = vadd.s32 536870912, %v1346_v16 }
 0x113   :  { %v1065_v14 = vsel %vm1058_vm14, %v1061_v15, %v1064_v35  ;;  %v1169_v48 = vsel %vm1162_vm0, %v1165_v54, %v1168_v47  ;;  %vm1184_vm1 = vcmp.lt.s32.totalorder %v3062_v4, 0  ;;  %v1423_v25 = vshrl.u32 %v1422_v59, 23 }
 0x114   :  { %v1265_v58 = vmul.f32 %v1264_v50, %v1262_v27  ;;  %v1066_v22 = vsel %vm1056_vm9, nan, %v1065_v14  ;;  %v1348_v53 = vshrl.u32 %v1347_v29, 30  ;;  %v3382_v62 = vadd.f32 %v3379_v21, %v960_v13 }
 0x115   :  { %v1269_v56 = vsel %vm1184_vm1, %v1268_v43, %v3280_v10  ;;  %v1170_v36 = vsel %vm1056_vm9, nan, %v1169_v48  ;;  %v1172_v12 = vmul.f32 0.5, %v1066_v22  ;;  %vm3391_vm2 = vcmp.le.f32.partialorder %v1182_v61, 0.7853982 }
 0x116   :  { %v1266_v24 = vxor.u32 2147483648, %v1265_v58  ;;  %v1349_v51 = vshll.u32 %v1348_v53, 30  ;;  %v1419_v18 = vand.u32 2147483647, %v3358_v3  ;;  %v2205_v40 = vadd.s32 4294967169, %v1423_v25 }
 0x117   :  { %v3398_v8 = vadd.f32 2.5, %v1066_v22  ;;  %v1174_v10 = vmul.f32 0.5, %v1170_v36  ;;  %v1177_v20 = vmul.f32 2.0, %v3382_v62  ;;  %v1271_v44 = vsel %vm3391_vm2, 0, %v1269_v56 }
 0x118   :  { %v3395_v19 = vsub.s32 %v1346_v16, %v1349_v51  ;;  %v3403_v39 = vadd.f32 1.05, %v1172_v12  ;;  %v1267_v61 = vsel %vm1184_vm1, %v1266_v24, %v1265_v58  ;;  %v1429_v60 = vadd.s32 1, %v2205_v40 }
 0x119   :  { %vm1288_vm3 = vcmp.lt.s32.totalorder %v3158_v17, 0  ;;  %v1372_v46 = vsub.s32 4, %v1348_v53  ;;  %v1411_v49 = vmul.f32 0.05, %v3382_v62  ;;  %v3410_v23 = vand.u32 3, %v1271_v44 }
 0x11a   :  { %v1352_v33 = vsub.s32 0, %v3395_v19  ;;  %vm3414_vm4 = vcmp.le.f32.partialorder %v1286_v7, 0.7853982  ;;  %v1426_v50 = vand.u32 8388607, %v1419_v18  ;;  %v1175_v35 = vsub.f32 0.0, %v1174_v10 }
 0x11b   :  { %v3422_v27 = vadd.f32 %v1177_v20, %v3327_v31  ;;  %v1270_v63 = vsel %vm3391_vm2, %v3062_v4, %v1267_v61  ;;  %vm1430_vm5 = vcmp.gt.s32.totalorder %v1429_v60, 0  ;;  %v1396_v7 = vmul.f32 1.05, %v3398_v8 }
 0x11c   :  { %v2202_v5 = vmin.u32 %v1352_v33, %v3395_v19  ;;  %v1397_v54 = vmul.f32 %v3403_v39, %v3403_v39  ;;  %v1431_v47 = vsel %vm1430_vm5, %v1429_v60, 0  ;;  %v3432_v16 = vsel %vm1288_vm3, %v1372_v46, %v1348_v53 }
 0x11d   :  { %v3435_v13 = vadd.f32 %v3059_v38, %v1411_v49  ;;  %v1433_v14 = vand.u32 31, %v1431_v47  ;;  %v3439_v43 = vadd.f32 %v3382_v62, %v3032_v9  ;;  %2330 = vcosq.f32 %v1270_v63 }
 0x11e   :  { %v1354_v15 = vclz %v2202_v5  ;;  %v1342_v59 = vadd.s32 %v3335_v1, %v3341_v57  ;;  %v1427_v29 = vor.u32 8388608, %v1426_v50  ;;  %v3444_v22 = vmul.f32 %v1175_v35, %v3327_v31 }
 0x11f   :  { %v3447_v48 = vmul.f32 %v1174_v10, %v3382_v62  ;;  %2332 = vsinq.f32 %v1270_v63  ;;  %v1434_v38 = vsub.s32 32, %v1433_v14  ;;  %v1375_v9 = vsel %vm3414_vm4, 0, %v3432_v16 }
 0x120   :  { %v2203_v58 = vadd.s32 4294967294, %v1354_v15  ;;  %v3452_v53 = vsub.f32 %v1396_v7, %v1397_v54  ;;  %v1640_v25 = vand.u32 2139095040, %v3435_v13  ;;  %v1436_v57 = vshll.u32 %v2470_v26, %v1433_v14 }
 0x121   :  { %v1437_v56 = vshrl.u32 %v2471_v28, %v1434_v38  ;;  %v1439_v36 = vshll.u32 %v2471_v28, %v1433_v14  ;;  %v1442_v11 = vshll.u32 %v2472_v30, %v1433_v14  ;;  %v1432_v40 = vshrl.u32 %v1431_v47, 5 }
 0x122   :  { %vm2204_vm6 = vcmp.lt.s32.totalorder %v2203_v58, 0  ;;  %v1440_v10 = vshrl.u32 %v2472_v30, %v1434_v38  ;;  %v1443_v20 = vshrl.u32 %v2473_v32, %v1434_v38  ;;  %v1445_v44 = vshll.u32 %v2473_v32, %v1433_v14 }
 0x123   :  { %v1357_v1 = vsel %vm2204_vm6, 0, %v2203_v58  ;;  %v1448_v60 = vshll.u32 %v2474_v34, %v1433_v14  ;;  %v3464_v46 = vshll.u32 %v1427_v29, 8  ;;  %v1435_v49 = vshrl.u32 %v2470_v26, %v1434_v38 }
 0x124   :  { %v1358_v12 = vsub.s32 32, %v1357_v1  ;;  %v1359_v24 = vshll.u32 %v3395_v19, %v1357_v1  ;;  %v1362_v51 = vsub.s32 4294967266, %v1357_v1  ;;  %v1438_v5 = vor.u32 %v1437_v56, %v1436_v57 }
 0x125   :  { %v1441_v19 = vor.u32 %v1440_v10, %v1439_v36  ;;  %v1446_v50 = vshrl.u32 %v2474_v34, %v1434_v38  ;;  %2334 = vrcp.f32 %v3452_v53  ;;  %v1444_v15 = vor.u32 %v1443_v20, %v1442_v11 }
 0x126   :  { %v1360_v61 = vshrl.u32 %v1342_v59, %v1358_v12  ;;  %v1363_v33 = vadd.s32 127, %v1362_v51  ;;  %v1449_v54 = vshrl.u32 %v2475_v42, %v1434_v38  ;;  %vm1451_vm7 = vcmp.lt.s32.totalorder %v1432_v40, 1 }
 0x127   :  { %v1447_v7 = vor.u32 %v1446_v50, %v1445_v44  ;;  %v1641_v47 = vshrl.u32 %v1640_v25, 23  ;;  %v2331_v59 = vpop.eup %2330  ;;  %vm1452_vm8 = vcmp.lt.s32.totalorder %v1432_v40, 2  ;;  %vm1453_vm9 = vcmp.lt.s32.totalorder %v1432_v40, 3 }
 0x128   :  { %v1361_v35 = vor.u32 %v1360_v61, %v1359_v24  ;;  %v1364_v63 = vshll.u32 %v1363_v33, 23  ;;  %vm1277_vm10 = vcmp.eq.s32.totalorder %v3410_v23, 0  ;;  %vm1280_vm11 = vcmp.eq.s32.totalorder %v3410_v23, 2 }
 0x129   :  { %v2333_v29 = vpop.eup %2332  ;;  %v1450_v1 = vor.u32 %v1449_v54, %v1448_v60  ;;  %vm1454_vm12 = vcmp.lt.s32.totalorder %v1432_v40, 4  ;;  %v1455_v57 = vsel %vm1451_vm7, %v1435_v49, %v1438_v5  ;;  %v1459_v56 = vsel %vm1451_vm7, %v1438_v5, %v1441_v19 }
 0x12a   :  { %v1365_v14 = vor.u32 4788187, %v1364_v63  ;;  %v1368_v58 = vcvt.s32.f32 %v1361_v35  ;;  %v1456_v38 = vsel %vm1454_vm12, %v1444_v15, 2102212464  ;;  %v1460_v12 = vsel %vm1454_vm12, %v1447_v7, 920167782 }
 0x12b   :  { %v1463_v25 = vsel %vm1451_vm7, %v1441_v19, %v1444_v15  ;;  %v1457_v24 = vsel %vm1453_vm9, %v1441_v19, %v1456_v38  ;;  %v1461_v51 = vsel %vm1453_vm9, %v1444_v15, %v1460_v12  ;;  %v1464_v11 = vsel %vm1454_vm12, %v1450_v1, 1326507024 }
 0x12c   :  { %v1366_v36 = vand.u32 2147483647, %v1365_v14  ;;  %v2213_v10 = vadd.s32 4294967169, %v1641_v47  ;;  %v1462_v44 = vsel %vm1452_vm8, %v1459_v56, %v1461_v51  ;;  %v1465_v61 = vsel %vm1453_vm9, %v1447_v7, %v1464_v11 }
 0x12d   :  { %v3481_v33 = vadd.f32 %v3358_v3, %v3435_v13  ;;  %v1458_v60 = vsel %vm1452_vm8, %v1455_v57, %v1457_v24  ;;  %v1466_v49 = vsel %vm1452_vm8, %v1463_v25, %v1465_v61  ;;  %vm1276_vm13 = vcmp.lt.s32.totalorder %v3410_v23, 2 }
 0x12e   :  { %v1369_v20 = vmul.f32 %v1368_v58, %v1366_v36  ;;  %v3486_v5 = vmul.u32.u64.low %v3464_v46, %v1462_v44  ;;  %v3487_v19 = vmul.u32.u64.high %v3464_v46, %v1462_v44, %v3486_v5  ;;  %v1647_v15 = vadd.s32 1, %v2213_v10 }
 0x12f   :  { %v3492_v35 = vmul.u32.u64.low %v3464_v46, %v1466_v49  ;;  %v3493_v63 = vmul.u32.u64.high %v3464_v46, %v1466_v49, %v3492_v35  ;;  %v3497_v7 = vmul.f32 %v3447_v48, %v3382_v62  ;;  %v1281_v54 = vxor.u32 2147483648, %v2331_v59  ;;  %v3506_v14 = vpop.eup %2334 }
 0x130   :  { %v1370_v50 = vxor.u32 2147483648, %v1369_v20  ;;  %v3503_v40 = vand.u32 3, %v1375_v9  ;;  %v1637_v47 = vand.u32 2147483647, %v3435_v13  ;;  %v1278_v58 = vxor.u32 2147483648, %v2333_v29 }
 0x131   :  { %v1474_v57 = vmul.u32 %v3464_v46, %v1458_v60  ;;  %vm1648_vm14 = vcmp.gt.s32.totalorder %v1647_v15, 0  ;;  %vm1274_vm15 = vweird.f32 %v3062_v4  ;;  %v1477_v16 = vadd.s32 1, %v3487_v19 }
 0x132   :  { %v1371_v1 = vsel %vm1288_vm3, %v1370_v50, %v1369_v20  ;;  %v1649_v48 = vsel %vm1648_vm14, %v1647_v15, 0  ;;  %v1744_v9 = vand.u32 2139095040, %v3481_v33  ;;  %v3519_v56 = vmul.f32 %v3422_v27, %v3444_v22 }
 0x133   :  { %v1374_v62 = vsel %vm3414_vm4, %v3158_v17, %v1371_v1  ;;  %vm1476_vm0 = vc.u32 %v3493_v63, %v3486_v5  ;;  %v3524_v46 = vmul.f32 2.0, %v3439_v43  ;;  %v1394_v55 = vsub.f32 %v2708_v2, %v3497_v7 }
 0x134   :  { %2336 = vcosq.f32 %v1374_v62  ;;  %v1478_v36 = vsel %vm1476_vm0, %v1477_v16, %v3487_v19  ;;  %v1651_v38 = vand.u32 31, %v1649_v48  ;;  %v1279_v12 = vsel %vm1277_vm10, %v2331_v59, %v1278_v58 }
 0x135   :  { %2338 = vsinq.f32 %v1374_v62  ;;  %v1282_v27 = vsel %vm1280_vm11, %v1281_v54, %v2333_v29  ;;  %vm1384_vm1 = vcmp.eq.s32.totalorder %v3503_v40, 2  ;;  %v1479_v22 = vadd.s32 %v1478_v36, %v1474_v57 }
 0x136   :  { %v1644_v43 = vand.u32 8388607, %v1637_v47  ;;  %vm1381_vm2 = vcmp.eq.s32.totalorder %v3503_v40, 0  ;;  %v3537_v25 = vshrl.u32 %v1649_v48, 5  ;;  %v1652_v24 = vsub.s32 32, %v1651_v38 }
 0x137   :  { %v1654_v51 = vshll.u32 %v2470_v26, %v1651_v38  ;;  %v1745_v11 = vshrl.u32 %v1744_v9, 23  ;;  %vm1380_vm3 = vcmp.lt.s32.totalorder %v3503_v40, 2  ;;  %v1480_v59 = vadd.s32 536870912, %v1479_v22 }
 0x138   :  { %v1657_v10 = vshll.u32 %v2471_v28, %v1651_v38  ;;  %v1660_v29 = vshll.u32 %v2472_v30, %v1651_v38  ;;  %v1663_v20 = vshll.u32 %v2473_v32, %v1651_v38  ;;  %vm1378_vm4 = vweird.f32 %v3158_v17 }
 0x139   :  { %v1655_v44 = vshrl.u32 %v2471_v28, %v1652_v24  ;;  %v1658_v61 = vshrl.u32 %v2472_v30, %v1652_v24  ;;  %v1661_v60 = vshrl.u32 %v2473_v32, %v1652_v24  ;;  %v1666_v49 = vshll.u32 %v2474_v34, %v1651_v38 }
 0x13a   :  { %v3549_v19 = vshrl.u32 %v1480_v59, 30  ;;  %v1645_v50 = vor.u32 8388608, %v1644_v43  ;;  %v1664_v35 = vshrl.u32 %v2474_v34, %v1652_v24  ;;  %v1667_v15 = vshrl.u32 %v2475_v42, %v1652_v24 }
 0x13b   :  { %v1283_v54 = vsel %vm1276_vm13, %v1279_v12, %v1282_v27  ;;  %v1656_v58 = vor.u32 %v1655_v44, %v1654_v51  ;;  %vm1672_vm5 = vcmp.lt.s32.totalorder %v3537_v25, 4  ;;  %v2217_v1 = vadd.s32 4294967169, %v1745_v11 }
 0x13c   :  { %v1482_v57 = vshll.u32 %v3549_v19, 30  ;;  %v1659_v62 = vor.u32 %v1658_v61, %v1657_v10  ;;  %v1662_v16 = vor.u32 %v1661_v60, %v1660_v29  ;;  %v1665_v48 = vor.u32 %v1664_v35, %v1663_v20 }
 0x13d   :  { %v3559_v9 = vmul.f32 %v3506_v14, %v3452_v53  ;;  %v1668_v36 = vor.u32 %v1667_v15, %v1666_v49  ;;  %vm1669_vm6 = vcmp.lt.s32.totalorder %v3537_v25, 1  ;;  %vm1671_vm7 = vcmp.lt.s32.totalorder %v3537_v25, 3 }
 0x13e   :  { %v2337_v23 = vpop.eup %2336  ;;  %v1284_v38 = vsel %vm1274_vm15, nan, %v1283_v54  ;;  %v3565_v12 = vsub.s32 %v1479_v22, %v1482_v57  ;;  %v1653_v27 = vshrl.u32 %v2470_v26, %v1652_v24  ;;  %v1678_v43 = vsel %vm1672_vm5, %v1665_v48, 920167782 }
 0x13f   :  { %v2339_v51 = vpop.eup %2338  ;;  %v1385_v11 = vxor.u32 2147483648, %v2337_v23  ;;  %vm1670_vm8 = vcmp.lt.s32.totalorder %v3537_v25, 2  ;;  %v1674_v53 = vsel %vm1672_vm5, %v1662_v16, 2102212464  ;;  %v1751_v59 = vadd.s32 1, %v2217_v1 }
 0x140   :  { %v1382_v10 = vxor.u32 2147483648, %v2339_v51  ;;  %v1485_v29 = vsub.s32 0, %v3565_v12  ;;  %v1677_v4 = vsel %vm1669_vm6, %v1656_v58, %v1659_v62  ;;  %v1679_v22 = vsel %vm1671_vm7, %v1662_v16, %v1678_v43 }
 0x141   :  { %v1386_v24 = vsel %vm1384_vm1, %v1385_v11, %v2339_v51  ;;  %v1681_v20 = vsel %vm1669_vm6, %v1659_v62, %v1662_v16  ;;  %v1682_v44 = vsel %vm1672_vm5, %v1668_v36, 1326507024  ;;  %v1685_v61 = vshll.u32 %v1645_v50, 8 }
 0x142   :  { %v1383_v60 = vsel %vm1381_vm2, %v2337_v23, %v1382_v10  ;;  %v2206_v49 = vmin.u32 %v1485_v29, %v3565_v12  ;;  %v1673_v35 = vsel %vm1669_vm6, %v1653_v27, %v1656_v58  ;;  %v1675_v15 = vsel %vm1671_vm7, %v1659_v62, %v1674_v53 }
 0x143   :  { %v1387_v54 = vsel %vm1380_vm3, %v1383_v60, %v1386_v24  ;;  %v1390_v1 = vmul.f32 14.7, %v1284_v38  ;;  %vm1421_vm9 = vcmp.lt.s32.totalorder %v3358_v3, 0  ;;  %v1680_v50 = vsel %vm1670_vm8, %v1677_v4, %v1679_v22 }
 0x144   :  { %v1683_v57 = vsel %vm1671_vm7, %v1665_v48, %v1682_v44  ;;  %v1388_v16 = vsel %vm1378_vm4, nan, %v1387_v54  ;;  %v1487_v36 = vclz %v2206_v49  ;;  %vm1752_vm10 = vcmp.gt.s32.totalorder %v1751_v59, 0 }
 0x145   :  { %v1684_v58 = vsel %vm1670_vm8, %v1681_v20, %v1683_v57  ;;  %v1389_v62 = vmul.f32 4.9, %v1388_v16  ;;  %v1392_v40 = vsub.f32 0.0, %v3519_v56  ;;  %v1676_v23 = vsel %vm1670_vm8, %v1673_v35, %v1675_v15 }
 0x146   :  { %v1741_v38 = vand.u32 2147483647, %v3481_v33  ;;  %v2207_v27 = vadd.s32 4294967294, %v1487_v36  ;;  %v3606_v43 = vmul.u32.u64.low %v1685_v61, %v1684_v58  ;;  %v3607_v51 = vmul.u32.u64.high %v1685_v61, %v1684_v58, %v3606_v43 }
 0x147   :  { %v1753_v48 = vsel %vm1752_vm10, %v1751_v59, 0  ;;  %v1391_v17 = vadd.f32 %v1390_v1, %v1389_v62  ;;  %v1395_v11 = vsub.f32 %v1394_v55, %v1389_v62  ;;  %v1401_v56 = vsub.f32 2.0, %v3559_v9 }
 0x148   :  { %v3612_v53 = vmul.u32.u64.low %v1685_v61, %v1680_v50  ;;  %v3613_v10 = vmul.u32.u64.high %v1685_v61, %v1680_v50, %v3612_v53  ;;  %v1475_v25 = vadd.s32 %v3486_v5, %v3493_v63  ;;  %vm2208_vm11 = vcmp.lt.s32.totalorder %v2207_v27, 0 }
 0x149   :  { %v1505_v29 = vsub.s32 4, %v3549_v19  ;;  %v1393_v4 = vsub.f32 %v1392_v40, %v1391_v17  ;;  %v1404_v59 = vmul.f32 %v1395_v11, %v3403_v39  ;;  %v1490_v22 = vsel %vm2208_vm11, 0, %v2207_v27 }
 0x14a   :  { %v1692_v24 = vmul.u32 %v1685_v61, %v1676_v23  ;;  %v1491_v20 = vsub.s32 32, %v1490_v22  ;;  %v1492_v7 = vshll.u32 %v3565_v12, %v1490_v22  ;;  %v1495_v55 = vsub.s32 4294967266, %v1490_v22 }
 0x14b   :  { %v1755_v44 = vand.u32 31, %v1753_v48  ;;  %v1403_v60 = vmul.f32 1.05, %v1393_v4  ;;  %vm1694_vm12 = vc.u32 %v3607_v51, %v3612_v53  ;;  %v1695_v9 = vadd.s32 1, %v3613_v10 }
 0x14c   :  { %v1748_v5 = vand.u32 8388607, %v1741_v38  ;;  %v1493_v63 = vshrl.u32 %v1475_v25, %v1491_v20  ;;  %v1496_v49 = vadd.s32 127, %v1495_v55  ;;  %v1506_v61 = vsel %vm1421_vm9, %v1505_v29, %v3549_v19 }
 0x14d   :  { %v3631_v35 = vmul.f32 %v3506_v14, %v1401_v56  ;;  %v1405_v12 = vsub.f32 %v1403_v60, %v1404_v59  ;;  %vm3635_vm13 = vcmp.le.f32.partialorder %v1419_v18, 0.7853982  ;;  %v1696_v54 = vsel %vm1694_vm12, %v1695_v9, %v3613_v10 }
 0x14e   :  { %v1494_v1 = vor.u32 %v1493_v63, %v1492_v7  ;;  %v1497_v50 = vshll.u32 %v1496_v49, 23  ;;  %v1697_v57 = vadd.s32 %v1696_v54, %v1692_v24  ;;  %v1756_v16 = vsub.s32 32, %v1755_v44 }
 0x14f   :  { %v1508_v36 = vsel %vm3635_vm13, 0, %v1506_v61  ;;  %v1749_v19 = vor.u32 8388608, %v1748_v5  ;;  %v3642_v58 = vshrl.u32 %v1753_v48, 5  ;;  %v3646_v14 = vadd.f32 %v3379_v21, %v3524_v46 }
 0x150   :  { %v1407_v18 = vmul.f32 %v1395_v11, %v3398_v8  ;;  %v1498_v62 = vor.u32 4788187, %v1497_v50  ;;  %v1501_v40 = vcvt.s32.f32 %v1494_v1  ;;  %v1698_v23 = vadd.s32 536870912, %v1697_v57 }
 0x151   :  { %v3650_v27 = vmul.f32 %v1405_v12, %v3631_v35  ;;  %v1408_v43 = vmul.f32 %v1393_v4, %v3403_v39  ;;  %v1758_v17 = vshll.u32 %v2470_v26, %v1755_v44  ;;  %v1761_v10 = vshll.u32 %v2471_v28, %v1755_v44 }
 0x152   :  { %v1499_v48 = vand.u32 2147483647, %v1498_v62  ;;  %v3655_v56 = vshrl.u32 %v1698_v23, 30  ;;  %v1759_v46 = vshrl.u32 %v2471_v28, %v1756_v16  ;;  %v1762_v25 = vshrl.u32 %v2472_v30, %v1756_v16 }
 0x153   :  { %v1764_v8 = vshll.u32 %v2472_v30, %v1755_v44  ;;  %v1765_v11 = vshrl.u32 %v2473_v32, %v1756_v16  ;;  %v1767_v29 = vshll.u32 %v2473_v32, %v1755_v44  ;;  %v1768_v59 = vshrl.u32 %v2474_v34, %v1756_v16 }
 0x154   :  { %v1502_v39 = vmul.f32 %v1501_v40, %v1499_v48  ;;  %v1615_v4 = vadd.s32 3, %v1508_v36  ;;  %v1700_v22 = vshll.u32 %v3655_v56, 30  ;;  %v3664_v24 = vshll.u32 %v1749_v19, 8 }
 0x155   :  { %v1409_v20 = vsub.f32 %v1407_v18, %v1408_v43  ;;  %v1757_v7 = vshrl.u32 %v2470_v26, %v1756_v16  ;;  %v1770_v55 = vshll.u32 %v2474_v34, %v1755_v44  ;;  %v1771_v60 = vshrl.u32 %v2475_v42, %v1756_v16 }
 0x156   :  { %v1503_v9 = vxor.u32 2147483648, %v1502_v39  ;;  %v3669_v5 = vsub.s32 %v1697_v57, %v1700_v22  ;;  %v1760_v63 = vor.u32 %v1759_v46, %v1758_v17  ;;  %v1763_v49 = vor.u32 %v1762_v25, %v1761_v10 }
 0x157   :  { %v1415_v61 = vmul.f32 0.05, %v3650_v27  ;;  %v1766_v12 = vor.u32 %v1765_v11, %v1764_v8  ;;  %v1769_v54 = vor.u32 %v1768_v59, %v1767_v29  ;;  %vm1773_vm14 = vcmp.lt.s32.totalorder %v3642_v58, 1 }
 0x158   :  { %v1504_v1 = vsel %vm1421_vm9, %v1503_v9, %v1502_v39  ;;  %v1703_v50 = vsub.s32 0, %v3669_v5  ;;  %vm1774_vm15 = vcmp.lt.s32.totalorder %v3642_v58, 2  ;;  %vm1776_vm0 = vcmp.lt.s32.totalorder %v3642_v58, 4 }
 0x159   :  { %v1507_v44 = vsel %vm3635_vm13, %v3358_v3, %v1504_v1  ;;  %v1772_v57 = vor.u32 %v1771_v60, %v1770_v55  ;;  %vm1775_vm1 = vcmp.lt.s32.totalorder %v3642_v58, 3  ;;  %v1778_v16 = vsel %vm1776_vm0, %v1766_v12, 2102212464 }
 0x15a   :  { %2340 = vcosq.f32 %v1507_v44  ;;  %v2214_v19 = vmin.u32 %v1703_v50, %v3669_v5  ;;  %v1777_v18 = vsel %vm1773_vm14, %v1757_v7, %v1760_v63  ;;  %v1781_v62 = vsel %vm1773_vm14, %v1760_v63, %v1763_v49 }
 0x15b   :  { %v3690_v40 = vadd.f32 %v3379_v21, %v1415_v61  ;;  %2342 = vsinq.f32 %v1507_v44  ;;  %v1779_v15 = vsel %vm1775_vm1, %v1763_v49, %v1778_v16  ;;  %v1782_v23 = vsel %vm1776_vm0, %v1769_v54, 920167782 }
 0x15c   :  { %v1705_v43 = vclz %v2214_v19  ;;  %v1783_v17 = vsel %vm1775_vm1, %v1766_v12, %v1782_v23  ;;  %v1785_v10 = vsel %vm1773_vm14, %v1763_v49, %v1766_v12  ;;  %v1872_v48 = vadd.f32 %v3327_v31, %v2989_v0 }
 0x15d   :  { %v1512_v46 = vand.u32 3, %v1508_v36  ;;  %v1780_v21 = vsel %vm1774_vm15, %v1777_v18, %v1779_v15  ;;  %v1784_v25 = vsel %vm1774_vm15, %v1781_v62, %v1783_v17  ;;  %v1786_v8 = vsel %vm1776_vm0, %v1772_v57, 1326507024  ;;  %v2366_v18 = vld [vmem:[#allocation2] sm:$0xff] }
 0x15e   :  { %v2215_v11 = vadd.s32 4294967294, %v1705_v43  ;;  %v1787_v29 = vsel %vm1775_vm1, %v1769_v54, %v1786_v8  ;;  %v3711_v59 = vmul.u32.u64.low %v3664_v24, %v1784_v25  ;;  %v3712_v39 = vmul.u32.u64.high %v3664_v24, %v1784_v25, %v3711_v59 }
 0x15f   :  { %v3716_v0 = vmul.f32 %v1409_v20, %v3631_v35  ;;  %v1616_v31 = vand.u32 3, %v1615_v4  ;;  %v1788_v36 = vsel %vm1774_vm15, %v1785_v10, %v1787_v29  ;;  %v1869_v22 = vadd.f32 %v3646_v14, %v3690_v40 }
 0x160   :  { %v1693_v7 = vadd.s32 %v3612_v53, %v3607_v51  ;;  %vm2216_vm2 = vcmp.lt.s32.totalorder %v2215_v11, 0  ;;  %v3725_v55 = vmul.u32.u64.low %v3664_v24, %v1788_v36  ;;  %v3726_v60 = vmul.u32.u64.high %v3664_v24, %v1788_v36, %v3725_v55 }
 0x161   :  { %vm1511_vm3 = vweird.f32 %v3358_v3  ;;  %vm1513_vm4 = vcmp.lt.s32.totalorder %v1512_v46, 2  ;;  %v1708_v35 = vsel %vm2216_vm2, 0, %v2215_v11  ;;  %v1796_v4 = vmul.u32 %v3664_v24, %v1780_v21 }
 0x162   :  { %v1709_v20 = vsub.s32 32, %v1708_v35  ;;  %v1710_v58 = vshll.u32 %v3669_v5, %v1708_v35  ;;  %v1713_v9 = vsub.s32 4294967266, %v1708_v35  ;;  %v1799_v14 = vadd.s32 1, %v3712_v39 }
 0x163   :  { %v1417_v63 = vmul.f32 0.05, %v3716_v0  ;;  %vm1514_vm5 = vcmp.eq.s32.totalorder %v1512_v46, 0  ;;  %vm1517_vm6 = vcmp.eq.s32.totalorder %v1512_v46, 2  ;;  %v1870_v51 = vmul.f32 0.008333334, %v1869_v22 }
 0x164   :  { %v2341_v53 = vpop.eup %2340  ;;  %vm1617_vm7 = vcmp.lt.s32.totalorder %v1616_v31, 2  ;;  %v1711_v49 = vshrl.u32 %v1693_v7, %v1709_v20  ;;  %v1714_v61 = vadd.s32 127, %v1713_v9  ;;  %vm1798_vm8 = vc.u32 %v3726_v60, %v3711_v59 }
 0x165   :  { %v2343_v12 = vpop.eup %2342  ;;  %v1518_v24 = vxor.u32 2147483648, %v2341_v53  ;;  %vm1618_vm9 = vcmp.eq.s32.totalorder %v1616_v31, 0  ;;  %v1800_v5 = vsel %vm1798_vm8, %v1799_v14, %v3712_v39  ;;  %v1873_v54 = vmul.f32 2.0, %v1872_v48 }
 0x166   :  { %v1515_v1 = vxor.u32 2147483648, %v2343_v12  ;;  %v1712_v50 = vor.u32 %v1711_v49, %v1710_v58  ;;  %v1715_v44 = vshll.u32 %v1714_v61, 23  ;;  %v1801_v57 = vadd.s32 %v1800_v5, %v1796_v4 }
 0x167   :  { %v3737_v16 = vadd.f32 %v3324_v41, %v1417_v63  ;;  %v1519_v19 = vsel %vm1517_vm6, %v1518_v24, %v2343_v12  ;;  %vm1621_vm10 = vcmp.eq.s32.totalorder %v1616_v31, 2  ;;  %v3740_v62 = vadd.f32 %v2366_v18, %v1870_v51 }
 0x168   :  { %v1516_v15 = vsel %vm1514_vm5, %v2341_v53, %v1515_v1  ;;  %v1716_v23 = vor.u32 4788187, %v1715_v44  ;;  %v1719_v43 = vcvt.s32.f32 %v1712_v50  ;;  %v1723_v17 = vsub.s32 4, %v3655_v56 }
 0x169   :  { %v1520_v10 = vsel %vm1513_vm4, %v1516_v15, %v1519_v19  ;;  %v1802_v48 = vadd.s32 536870912, %v1801_v57  ;;  %v1874_v21 = vadd.f32 %v3324_v41, %v1873_v54  ;;  %v1893_v25 = vand.u32 2139095040, %v3740_v62 }
 0x16a   :  { %v1521_v8 = vsel %vm1511_vm3, nan, %v1520_v10  ;;  %v1620_v11 = vsel %vm1618_vm9, %v2341_v53, %v1515_v1  ;;  %v1623_v29 = vsel %vm1621_vm10, %v1518_v24, %v2343_v12  ;;  %v1717_v39 = vand.u32 2147483647, %v1716_v23  ;;  %v2367_v10 = vld [vmem:[#allocation2 + $0x8] sm:$0xff] }
 0x16b   :  { %vm1639_vm11 = vcmp.lt.s32.totalorder %v3435_v13, 0  ;;  %v1803_v36 = vshrl.u32 %v1802_v48, 30  ;;  %v1627_v22 = vmul.f32 0.5, %v1521_v8  ;;  %v1894_v55 = vshrl.u32 %v1893_v25, 23 }
 0x16c   :  { %v1720_v7 = vmul.f32 %v1719_v43, %v1717_v39  ;;  %v1724_v46 = vsel %vm1639_vm11, %v1723_v17, %v3655_v56  ;;  %v1624_v41 = vsel %vm1617_vm7, %v1620_v11, %v1623_v29  ;;  %v1632_v35 = vmul.f32 2.0, %v3690_v40 }
 0x16d   :  { %vm3758_vm12 = vcmp.le.f32.partialorder %v1637_v47, 0.7853982  ;;  %v1804_v20 = vshll.u32 %v1803_v36, 30  ;;  %v1875_v9 = vadd.f32 %v1874_v21, %v3737_v16  ;;  %v1890_v14 = vand.u32 2147483647, %v3740_v62 }
 0x16e   :  { %v1721_v58 = vxor.u32 2147483648, %v1720_v7  ;;  %v2221_v63 = vadd.s32 4294967169, %v1894_v55  ;;  %v1726_v56 = vsel %vm3758_vm12, 0, %v1724_v46  ;;  %v1625_v51 = vsel %vm1511_vm3, nan, %v1624_v41 }
 0x16f   :  { %v3766_v31 = vsub.s32 %v1801_v57, %v1804_v20  ;;  %v3770_v53 = vadd.f32 2.5, %v1521_v8  ;;  %v3772_v47 = vadd.f32 1.05, %v1627_v22  ;;  %v1878_v24 = vadd.f32 %v3650_v27, %v3355_v52 }
 0x170   :  { %v1900_v49 = vadd.s32 1, %v2221_v63  ;;  %v1722_v61 = vsel %vm1639_vm11, %v1721_v58, %v1720_v7  ;;  %v1884_v5 = vadd.f32 %v3716_v0, %v3295_v37  ;;  %v3782_v54 = vadd.f32 %v1632_v35, %v3737_v16 }
 0x171   :  { %v1807_v12 = vsub.s32 0, %v3766_v31  ;;  %vm1743_vm13 = vcmp.lt.s32.totalorder %v3481_v33, 0  ;;  %v1876_v3 = vmul.f32 0.008333334, %v1875_v9  ;;  %v1897_v1 = vand.u32 8388607, %v1890_v14 }
 0x172   :  { %v3787_v50 = vmul.f32 0.5, %v1625_v51  ;;  %v3789_v44 = vand.u32 3, %v1726_v56  ;;  %vm1901_vm14 = vcmp.gt.s32.totalorder %v1900_v49, 0  ;;  %v1725_v37 = vsel %vm3758_vm12, %v3435_v13, %v1722_v61 }
 0x173   :  { %v2218_v57 = vmin.u32 %v1807_v12, %v3766_v31  ;;  %vm3797_vm15 = vcmp.le.f32.partialorder %v1741_v38, 0.7853982  ;;  %v1827_v27 = vsub.s32 4, %v1803_v36  ;;  %v1851_v0 = vmul.f32 1.05, %v3770_v53 }
 0x174   :  { %v1852_v19 = vmul.f32 %v3772_v47, %v3772_v47  ;;  %v3804_v15 = vmul.f32 2.0, %v1878_v24  ;;  %v3806_v23 = vmul.f32 2.0, %v1884_v5  ;;  %v1902_v43 = vsel %vm1901_vm14, %v1900_v49, 0 }
 0x175   :  { %v1809_v18 = vclz %v2218_v57  ;;  %v1797_v17 = vadd.s32 %v3711_v59, %v3726_v60  ;;  %v3810_v38 = vadd.f32 %v2367_v10, %v1876_v3  ;;  %v1898_v48 = vor.u32 8388608, %v1897_v1 }
 0x176   :  { %v1904_v21 = vand.u32 31, %v1902_v43  ;;  %v1630_v25 = vsub.f32 0.0, %v3787_v50  ;;  %v3815_v8 = vmul.f32 %v3787_v50, %v3690_v40  ;;  %2344 = vcosq.f32 %v1725_v37 }
 0x177   :  { %v2219_v11 = vadd.s32 4294967294, %v1809_v18  ;;  %2346 = vsinq.f32 %v1725_v37  ;;  %v3819_v29 = vsel %vm1743_vm13, %v1827_v27, %v1803_v36  ;;  %v3821_v39 = vsub.f32 %v1851_v0, %v1852_v19 }
 0x178   :  { %v1905_v59 = vsub.s32 32, %v1904_v21  ;;  %v1903_v60 = vshrl.u32 %v1902_v43, 5  ;;  %v1907_v22 = vshll.u32 %v2470_v26, %v1904_v21  ;;  %v1910_v7 = vshll.u32 %v2471_v28, %v1904_v21 }
 0x179   :  { %vm2220_vm0 = vcmp.lt.s32.totalorder %v2219_v11, 0  ;;  %v1916_v35 = vshll.u32 %v2473_v32, %v1904_v21  ;;  %v1913_v58 = vshll.u32 %v2472_v30, %v1904_v21  ;;  %v1919_v56 = vshll.u32 %v2474_v34, %v1904_v21 }
 0x17a   :  { %v1812_v46 = vsel %vm2220_vm0, 0, %v2219_v11  ;;  %v1908_v55 = vshrl.u32 %v2471_v28, %v1905_v59  ;;  %v1911_v41 = vshrl.u32 %v2472_v30, %v1905_v59  ;;  %v1914_v9 = vshrl.u32 %v2473_v32, %v1905_v59 }
 0x17b   :  { %v1813_v4 = vsub.s32 32, %v1812_v46  ;;  %v1814_v36 = vshll.u32 %v3766_v31, %v1812_v46  ;;  %v1817_v20 = vsub.s32 4294967266, %v1812_v46  ;;  %v1917_v63 = vshrl.u32 %v2474_v34, %v1905_v59 }
 0x17c   :  { %v1920_v51 = vshrl.u32 %v2475_v42, %v1905_v59  ;;  %vm1735_vm1 = vcmp.eq.s32.totalorder %v3789_v44, 2  ;;  %v1830_v12 = vsel %vm3797_vm15, 0, %v3819_v29  ;;  %v3838_v31 = vshll.u32 %v1898_v48, 8 }
 0x17d   :  { %v1815_v49 = vshrl.u32 %v1797_v17, %v1813_v4  ;;  %v1818_v61 = vadd.s32 127, %v1817_v20  ;;  %vm1732_vm2 = vcmp.eq.s32.totalorder %v3789_v44, 0  ;;  %v1909_v24 = vor.u32 %v1908_v55, %v1907_v22 }
 0x17e   :  { %v1912_v5 = vor.u32 %v1911_v41, %v1910_v7  ;;  %v1918_v3 = vor.u32 %v1917_v63, %v1916_v35  ;;  %v3843_v1 = vadd.f32 %v3810_v38, %v3740_v62  ;;  %v1906_v27 = vshrl.u32 %v2470_v26, %v1905_v59 }
 0x17f   :  { %v1816_v57 = vor.u32 %v1815_v49, %v1814_v36  ;;  %v1819_v37 = vshll.u32 %v1818_v61, 23  ;;  %vm1922_vm3 = vcmp.lt.s32.totalorder %v1903_v60, 1  ;;  %2348 = vrcp.f32 %v3821_v39 }
 0x180   :  { %v1915_v0 = vor.u32 %v1914_v9, %v1913_v58  ;;  %v1921_v19 = vor.u32 %v1920_v51, %v1919_v56  ;;  %vm1925_vm4 = vcmp.lt.s32.totalorder %v1903_v60, 4  ;;  %v2345_v18 = vpop.eup %2344  ;;  %vm1731_vm5 = vcmp.lt.s32.totalorder %v3789_v44, 2 }
 0x181   :  { %v1820_v43 = vor.u32 4788187, %v1819_v37  ;;  %v1823_v17 = vcvt.s32.f32 %v1816_v57  ;;  %vm1924_vm6 = vcmp.lt.s32.totalorder %v1903_v60, 3  ;;  %v2101_v10 = vmul.f32 0.15915494, %v3740_v62  ;;  %v2347_v48 = vpop.eup %2346 }
 0x182   :  { %vm1923_vm7 = vcmp.lt.s32.totalorder %v1903_v60, 2  ;;  %v1927_v21 = vsel %vm1925_vm4, %v1915_v0, 2102212464  ;;  %v1930_v11 = vsel %vm1922_vm3, %v1909_v24, %v1912_v5  ;;  %v1931_v29 = vsel %vm1925_vm4, %v1918_v3, 920167782 }
 0x183   :  { %v1821_v59 = vand.u32 2147483647, %v1820_v43  ;;  %v1926_v22 = vsel %vm1922_vm3, %v1906_v27, %v1909_v24  ;;  %v1928_v7 = vsel %vm1924_vm6, %v1912_v5, %v1927_v21  ;;  %v1998_v46 = vand.u32 2139095040, %v3843_v1 }
 0x184   :  { %vm1729_vm8 = vweird.f32 %v3435_v13  ;;  %v1736_v55 = vxor.u32 2147483648, %v2345_v18  ;;  %v1932_v41 = vsel %vm1924_vm6, %v1915_v0, %v1931_v29  ;;  %v1934_v35 = vsel %vm1922_vm3, %v1912_v5, %v1915_v0 }
 0x185   :  { %v1935_v4 = vsel %vm1925_vm4, %v1921_v19, 1326507024  ;;  %v1733_v36 = vxor.u32 2147483648, %v2347_v48  ;;  %v1824_v20 = vmul.f32 %v1823_v17, %v1821_v59  ;;  %v1933_v58 = vsel %vm1923_vm7, %v1930_v11, %v1932_v41 }
 0x186   :  { %v1936_v9 = vsel %vm1924_vm6, %v1918_v3, %v1935_v4  ;;  %v1929_v63 = vsel %vm1923_vm7, %v1926_v22, %v1928_v7  ;;  %v3864_v51 = vmul.u32.u64.low %v3838_v31, %v1933_v58  ;;  %v3865_v49 = vmul.u32.u64.high %v3838_v31, %v1933_v58, %v3864_v51 }
 0x187   :  { %v1937_v56 = vsel %vm1923_vm7, %v1934_v35, %v1936_v9  ;;  %v1825_v61 = vxor.u32 2147483648, %v1824_v20  ;;  %v1999_v57 = vshrl.u32 %v1998_v46, 23  ;;  %v1631_v37 = vmul.f32 %v1630_v25, %v3737_v16 }
 0x188   :  { %v3869_v24 = vmul.u32.u64.low %v3838_v31, %v1937_v56  ;;  %v3870_v5 = vmul.u32.u64.high %v3838_v31, %v1937_v56, %v3869_v24  ;;  %v3877_v3 = vmul.f32 %v3815_v8, %v3690_v40  ;;  %v1737_v60 = vsel %vm1735_vm1, %v1736_v55, %v2347_v48 }
 0x189   :  { %v2102_v27 = vfloor.f32 %v2101_v10  ;;  %v1734_v0 = vsel %vm1732_vm2, %v2345_v18, %v1733_v36  ;;  %v1826_v19 = vsel %vm1743_vm13, %v1825_v61, %v1824_v20  ;;  %v1945_v43 = vmul.u32 %v3838_v31, %v1929_v63  ;;  %v3886_v21 = vpop.eup %2348 }
 0x18a   :  { %v2225_v17 = vadd.s32 4294967169, %v1999_v57  ;;  %v1829_v40 = vsel %vm3797_vm15, %v3481_v33, %v1826_v19  ;;  %v3891_v16 = vand.u32 3, %v1830_v12  ;;  %v1948_v50 = vadd.s32 1, %v3865_v49 }
 0x18b   :  { %v2103_v25 = vmul.f32 6.2831855, %v2102_v27  ;;  %2350 = vcosq.f32 %v1829_v40  ;;  %vm1947_vm9 = vc.u32 %v3870_v5, %v3864_v51  ;;  %v1995_v8 = vand.u32 2147483647, %v3843_v1 }
 0x18c   :  { %v2005_v18 = vadd.s32 1, %v2225_v17  ;;  %v1738_v31 = vsel %vm1731_vm5, %v1734_v0, %v1737_v60  ;;  %2352 = vsinq.f32 %v1829_v40  ;;  %v1949_v10 = vsel %vm1947_vm9, %v1948_v50, %v3865_v49 }
 0x18d   :  { %v2104_v52 = vsub.f32 %v3740_v62, %v2103_v25  ;;  %v1950_v12 = vadd.s32 %v1949_v10, %v1945_v43  ;;  %v3902_v48 = vadd.f32 3.1415927, %v3810_v38  ;;  %v3905_v11 = vmul.f32 %v3782_v54, %v1631_v37 }
 0x18e   :  { %vm2006_vm10 = vcmp.gt.s32.totalorder %v2005_v18, 0  ;;  %v3909_v29 = vadd.f32 %v3804_v15, %v2984_v45  ;;  %v3913_v44 = vadd.f32 %v3806_v23, %v2962_v6  ;;  %v1739_v22 = vsel %vm1729_vm8, nan, %v1738_v31 }
 0x18f   :  { %v2007_v59 = vsel %vm2006_vm10, %v2005_v18, 0  ;;  %2105 = vst [vmem:[#allocation7] sm:$0xff] %v2104_v52  ;;  %v1951_v7 = vadd.s32 536870912, %v1950_v12  ;;  %v2002_v38 = vand.u32 8388607, %v1995_v8  ;;  %vm1833_vm11 = vweird.f32 %v3481_v33 }
 0x190   :  { %v2009_v46 = vand.u32 31, %v2007_v59  ;;  %vm1835_vm12 = vcmp.lt.s32.totalorder %v3891_v16, 2  ;;  %vm1836_vm13 = vcmp.eq.s32.totalorder %v3891_v16, 0  ;;  %vm1839_vm14 = vcmp.eq.s32.totalorder %v3891_v16, 2 }
 0x191   :  { %v1849_v6 = vsub.f32 %v2708_v2, %v3877_v3  ;;  %v3927_v45 = vmul.f32 %v3886_v21, %v3821_v39  ;;  %v3929_v13 = vshrl.u32 %v1951_v7, 30  ;;  %v2107_v15 = vmul.f32 0.15915494, %v3902_v48 }
 0x192   :  { %v2010_v54 = vsub.s32 32, %v2009_v46  ;;  %v1845_v23 = vmul.f32 14.7, %v1739_v22  ;;  %v3932_v55 = vshrl.u32 %v2007_v59, 5  ;;  %v2012_v41 = vshll.u32 %v2470_v26, %v2009_v46 }
 0x193   :  { %v2015_v35 = vshll.u32 %v2471_v28, %v2009_v46  ;;  %v1953_v4 = vshll.u32 %v3929_v13, 30  ;;  %v2003_v36 = vor.u32 8388608, %v2002_v38  ;;  %v2021_v39 = vshll.u32 %v2473_v32, %v2009_v46 }
 0x194   :  { %v2013_v2 = vshrl.u32 %v2471_v28, %v2010_v54  ;;  %v2016_v20 = vshrl.u32 %v2472_v30, %v2010_v54  ;;  %v2018_v58 = vshll.u32 %v2472_v30, %v2009_v46  ;;  %v2019_v9 = vshrl.u32 %v2473_v32, %v2010_v54 }
 0x195   :  { %v2022_v63 = vshrl.u32 %v2474_v34, %v2010_v54  ;;  %v2351_v56 = vpop.eup %2350  ;;  %v3943_v49 = vsub.s32 %v1950_v12, %v1953_v4  ;;  %v2024_v61 = vshll.u32 %v2474_v34, %v2009_v46  ;;  %v2025_v24 = vshrl.u32 %v2475_v42, %v2010_v54 }
 0x196   :  { %v2108_v57 = vfloor.f32 %v2107_v15  ;;  %v2353_v37 = vpop.eup %2352  ;;  %v1840_v28 = vxor.u32 2147483648, %v2351_v56  ;;  %v2014_v3 = vor.u32 %v2013_v2, %v2012_v41  ;;  %v2017_v60 = vor.u32 %v2016_v20, %v2015_v35 }
 0x197   :  { %vm2027_vm15 = vcmp.lt.s32.totalorder %v3932_v55, 1  ;;  %v1837_v27 = vxor.u32 2147483648, %v2353_v37  ;;  %v1956_v30 = vsub.s32 0, %v3943_v49  ;;  %v2011_v32 = vshrl.u32 %v2470_v26, %v2010_v54 }
 0x198   :  { %v2023_v0 = vor.u32 %v2022_v63, %v2021_v39  ;;  %v1841_v19 = vsel %vm1839_vm14, %v1840_v28, %v2353_v37  ;;  %v2020_v43 = vor.u32 %v2019_v9, %v2018_v58  ;;  %vm2028_vm0 = vcmp.lt.s32.totalorder %v3932_v55, 2 }
 0x199   :  { %vm2030_vm1 = vcmp.lt.s32.totalorder %v3932_v55, 4  ;;  %v1838_v34 = vsel %vm1836_vm13, %v2351_v56, %v1837_v27  ;;  %v2222_v42 = vmin.u32 %v1956_v30, %v3943_v49  ;;  %v2026_v17 = vor.u32 %v2025_v24, %v2024_v61 }
 0x19a   :  { %vm2029_vm2 = vcmp.lt.s32.totalorder %v3932_v55, 3  ;;  %v1842_v26 = vsel %vm1835_vm12, %v1838_v34, %v1841_v19  ;;  %v2032_v40 = vsel %vm2030_vm1, %v2020_v43, 2102212464  ;;  %v2035_v50 = vsel %vm2027_vm15, %v2014_v3, %v2017_v60 }
 0x19b   :  { %v2036_v25 = vsel %vm2030_vm1, %v2023_v0, 920167782  ;;  %v1843_v18 = vsel %vm1833_vm11, nan, %v1842_v26  ;;  %v1847_v31 = vsub.f32 0.0, %v3905_v11  ;;  %v1958_v10 = vclz %v2222_v42 }
 0x19c   :  { %v2043_v52 = vshll.u32 %v2003_v36, 8  ;;  %v1844_v12 = vmul.f32 4.9, %v1843_v18  ;;  %v1856_v16 = vsub.f32 2.0, %v3927_v45  ;;  %v2037_v59 = vsel %vm2029_vm2, %v2020_v43, %v2036_v25  ;;  %v2369_v25 = vld [vmem:[#allocation2 + $0x18] sm:$0xff] }
 0x19d   :  { %v2109_v22 = vmul.f32 6.2831855, %v2108_v57  ;;  %v2223_v7 = vadd.s32 4294967294, %v1958_v10  ;;  %v2031_v38 = vsel %vm2027_vm15, %v2011_v32, %v2014_v3  ;;  %v2033_v46 = vsel %vm2029_vm2, %v2017_v60, %v2032_v40  ;;  %v2368_v40 = vld [vmem:[#allocation2 + $0x10] sm:$0xff] }
 0x19e   :  { %v2038_v33 = vsel %vm2028_vm0, %v2035_v50, %v2037_v59  ;;  %v1846_v11 = vadd.f32 %v1845_v23, %v1844_v12  ;;  %v1850_v54 = vsub.f32 %v1849_v6, %v1844_v12  ;;  %v2039_v15 = vsel %vm2027_vm15, %v2017_v60, %v2020_v43 }
 0x19f   :  { %v2040_v45 = vsel %vm2030_vm1, %v2026_v17, 1326507024  ;;  %vm2224_vm3 = vcmp.lt.s32.totalorder %v2223_v7, 0  ;;  %v3984_v35 = vmul.u32.u64.low %v2043_v52, %v2038_v33  ;;  %v3985_v4 = vmul.u32.u64.high %v2043_v52, %v2038_v33, %v3984_v35 }
 0x1a0   :  { %v2041_v41 = vsel %vm2029_vm2, %v2023_v0, %v2040_v45  ;;  %v1848_v36 = vsub.f32 %v1847_v31, %v1846_v11  ;;  %v1859_v2 = vmul.f32 %v1850_v54, %v3772_v47  ;;  %v1862_v23 = vmul.f32 %v1850_v54, %v3770_v53 }
 0x1a1   :  { %v1961_v6 = vsel %vm2224_vm3, 0, %v2223_v7  ;;  %v1857_v39 = vmul.f32 %v3886_v21, %v1856_v16  ;;  %v2034_v58 = vsel %vm2028_vm0, %v2031_v38, %v2033_v46  ;;  %v2042_v9 = vsel %vm2028_vm0, %v2039_v15, %v2041_v41 }
 0x1a2   :  { %v1966_v20 = vsub.s32 4294967266, %v1961_v6  ;;  %v1858_v63 = vmul.f32 1.05, %v1848_v36  ;;  %v1863_v56 = vmul.f32 %v1848_v36, %v3772_v47  ;;  %v1946_v57 = vadd.s32 %v3864_v51, %v3870_v5 }
 0x1a3   :  { %v3996_v61 = vmul.u32.u64.low %v2043_v52, %v2042_v9  ;;  %v3997_v24 = vmul.u32.u64.high %v2043_v52, %v2042_v9, %v3996_v61  ;;  %v1962_v53 = vsub.s32 32, %v1961_v6  ;;  %v2053_v37 = vadd.s32 1, %v3985_v4 }
 0x1a4   :  { %v2110_v21 = vsub.f32 %v3902_v48, %v2109_v22  ;;  %v1860_v28 = vsub.f32 %v1858_v63, %v1859_v2  ;;  %v1864_v3 = vsub.f32 %v1862_v23, %v1863_v56  ;;  %v1967_v60 = vadd.s32 127, %v1966_v20 }
 0x1a5   :  { %v2050_v27 = vmul.u32 %v2043_v52, %v2034_v58  ;;  %vm2052_vm4 = vc.u32 %v3997_v24, %v3984_v35  ;;  %v1963_v47 = vshll.u32 %v3943_v49, %v1961_v6  ;;  %v1964_v0 = vshrl.u32 %v1946_v57, %v1962_v53 }
 0x1a6   :  { %v2229_v55 = vadd.f32 -3.1415927, %v2110_v21  ;;  %v1861_v30 = vmul.f32 %v1860_v28, %v1857_v39  ;;  %v1865_v32 = vmul.f32 %v1864_v3, %v1857_v39  ;;  %v2054_v51 = vsel %vm2052_vm4, %v2053_v37, %v3985_v4 }
 0x1a7   :  { %v1968_v19 = vshll.u32 %v1967_v60, 23  ;;  %v2055_v43 = vadd.s32 %v2054_v51, %v2050_v27  ;;  %v1965_v26 = vor.u32 %v1964_v0, %v1963_v47 }
 0x1a8   :  { %2113 = vst [vmem:[#allocation7 + $0x8] sm:$0xff] %v2229_v55  ;;  %v1881_v5 = vadd.f32 %v3909_v29, %v1861_v30  ;;  %v1887_v48 = vadd.f32 %v3913_v44, %v1865_v32 }
 0x1a9   :  { %v2056_v17 = vadd.s32 536870912, %v2055_v43  ;;  %v1969_v18 = vor.u32 4788187, %v1968_v19 }
 0x1aa   :  { %v1882_v34 = vmul.f32 0.008333334, %v1881_v5  ;;  %v1888_v42 = vmul.f32 0.008333334, %v1887_v48 }
 0x1ab   :  { %v2057_v31 = vshrl.u32 %v2056_v17, 30 }
 0x1ac   :  { %v1883_v50 = vadd.f32 %v2368_v40, %v1882_v34  ;;  %v1889_v49 = vadd.f32 %v2369_v25, %v1888_v42 }
 0x1ad   :  { %v2058_v10 = vshll.u32 %v2057_v31, 30 }
 0x1ae   :  { %2115 = vst [vmem:[#allocation7 + $0x10] sm:$0xff] %v1883_v50  ;;  %2117 = vst [vmem:[#allocation7 + $0x18] sm:$0xff] %v1889_v49 }
 0x1af   :  { %2425 = shalt.err (!%p2422_p6)
}
 0x1b0   :  { %s2426_s14 = scalar_lea.hbm %s4064_s2, 512 }
 0x1b1   :  { %p2427_p7 = scmp.ne.s32.totalorder %s4064_s2, %s2426_s14  ;;  %p2430_p8 = scmp.lt.u32.totalorder %s2426_s14, %s4064_s2 }
 0x1b3   :  { %p2432_p9 = pnand %p2430_p8, %p2427_p7 }
 0x1b5   :  { %2435 = shalt.err (!%p2432_p9)
}
 0x1b6   :  { %2129 = dma.vmem_to_hbm [thread:$0]  %s2124_s10, 512, %s4064_s2, [#allocation4], %s2467_s22, %s2467_s22, %s2468_s23   ;;  %v1970_v29 = vand.u32 2147483647, %v1969_v18  ;;  %v1972_v44 = vcvt.s32.f32 %v1965_v26  ;;  %v2059_v52 = vsub.s32 %v2055_v43, %v2058_v10  ;;  %vm1892_vm5 = vcmp.lt.s32.totalorder %v3740_v62, 0 }
 0x1b7   :  { %v2051_v46 = vadd.s32 %v3984_v35, %v3997_v24  ;;  %vm4029_vm7 = vcmp.le.f32.partialorder %v1890_v14, 0.7853982  ;;  %v1976_v2 = vsub.s32 4, %v3929_v13  ;;  %v2081_v9 = vsub.s32 4, %v2057_v31  ;;  %s2477_s2 = smov [#allocation8]  }
 0x1b8   :  { %v2061_v12 = vsub.s32 0, %v2059_v52  ;;  %v1973_v16 = vmul.f32 %v1972_v44, %v1970_v29  ;;  %vm1997_vm8 = vcmp.lt.s32.totalorder %v3843_v1, 0  ;;  %vm1996_vm9 = vcmp.le.f32.partialorder %v1995_v8, 0.7853982  ;;  %s2136_s21 = sshll.u32 %s2477_s2, 4  ;;  %s2137_s21 = int_to_ptr.vmem [resolvable:$true] %s2136_s21 }
 0x1b9   :  { %v1977_v20 = vsel %vm1892_vm5, %v1976_v2, %v3929_v13  ;;  %v2082_v24 = vsel %vm1997_vm8, %v2081_v9, %v2057_v31  ;;  %vm1982_vm14 = vweird.f32 %v3740_v62  ;;  %vm2087_vm1 = vweird.f32 %v3843_v1  ;;  %s2436_s22 = scalar_lea.vmem %s2137_s21, 128  ;;  %p2441_p11 = scmp.lt.s32.totalorder %s2137_s21, %s2137_s21 }
 0x1ba   :  { %v2226_v59 = vmin.u32 %v2061_v12, %v2059_v52  ;;  %v1974_v7 = vxor.u32 2147483648, %v1973_v16  ;;  %v1979_v63 = vsel %vm4029_vm7, 0, %v1977_v20  ;;  %v2084_v21 = vsel %vm1996_vm9, 0, %v2082_v24  ;;  %p2437_p10 = scmp.ne.s32.totalorder %s2137_s21, %s2436_s22  ;;  %p2442_p12 = scmp.lt.s32.totalorder %s2436_s22, %s2436_s22 }
 0x1bb   :  { %v1983_v57 = vadd.s32 3, %v1979_v63  ;;  %v2088_v60 = vadd.s32 3, %v2084_v21 }
 0x1bc   :  { %v2063_v22 = vclz %v2226_v59  ;;  %v1975_v54 = vsel %vm1892_vm5, %v1974_v7, %v1973_v16  ;;  %p2443_p13 = por %p2442_p12, %p2441_p11 }
 0x1bd   :  { %v1978_v35 = vsel %vm4029_vm7, %v3740_v62, %v1975_v54  ;;  %v1984_v3 = vand.u32 3, %v1983_v57  ;;  %v2089_v30 = vand.u32 3, %v2088_v60 }
 0x1be   :  { %v2227_v38 = vadd.s32 4294967294, %v2063_v22  ;;  %2354 = vcosq.f32 %v1978_v35  ;;  %p2444_p0 = pnand %p2443_p13, %p2437_p10 }
 0x1bf   :  { %2356 = vsinq.f32 %v1978_v35  ;;  %vm1986_vm10 = vcmp.eq.s32.totalorder %v1984_v3, 0  ;;  %vm1989_vm11 = vcmp.eq.s32.totalorder %v1984_v3, 2  ;;  %vm1985_vm12 = vcmp.lt.s32.totalorder %v1984_v3, 2 }
 0x1c0   :  { %vm2228_vm6 = vcmp.lt.s32.totalorder %v2227_v38, 0  ;;  %vm2094_vm13 = vcmp.eq.s32.totalorder %v2089_v30, 2  ;;  %vm2091_vm15 = vcmp.eq.s32.totalorder %v2089_v30, 0  ;;  %vm2090_vm0 = vcmp.lt.s32.totalorder %v2089_v30, 2 }
 0x1c1   :  { %v2066_v11 = vsel %vm2228_vm6, 0, %v2227_v38 }
 0x1c2   :  { %v2067_v15 = vsub.s32 32, %v2066_v11  ;;  %v2068_v45 = vshll.u32 %v2059_v52, %v2066_v11  ;;  %v2071_v41 = vsub.s32 4294967266, %v2066_v11 }
 0x1c4   :  { %v2069_v4 = vshrl.u32 %v2051_v46, %v2067_v15  ;;  %v2072_v36 = vadd.s32 127, %v2071_v41 }
 0x1c6   :  { %v2070_v23 = vor.u32 %v2069_v4, %v2068_v45  ;;  %v2073_v14 = vshll.u32 %v2072_v36, 23 }
 0x1c8   :  { %v2074_v6 = vor.u32 4788187, %v2073_v14  ;;  %v2077_v39 = vcvt.s32.f32 %v2070_v23  ;;  %v2355_v13 = vpop.eup %2354 }
 0x1c9   :  { %v2357_v28 = vpop.eup %2356  ;;  %v1990_v55 = vxor.u32 2147483648, %v2355_v13 }
 0x1ca   :  { %v2075_v58 = vand.u32 2147483647, %v2074_v6  ;;  %v1987_v27 = vxor.u32 2147483648, %v2357_v28 }
 0x1cb   :  { %v1991_v32 = vsel %vm1989_vm11, %v1990_v55, %v2357_v28 }
 0x1cc   :  { %v2078_v56 = vmul.f32 %v2077_v39, %v2075_v58  ;;  %v1988_v8 = vsel %vm1986_vm10, %v2355_v13, %v1987_v27 }
 0x1cd   :  { %v1992_v51 = vsel %vm1985_vm12, %v1988_v8, %v1991_v32 }
 0x1ce   :  { %v2079_v61 = vxor.u32 2147483648, %v2078_v56  ;;  %v1993_v43 = vsel %vm1982_vm14, nan, %v1992_v51 }
 0x1d0   :  { %v2080_v53 = vsel %vm1997_vm8, %v2079_v61, %v2078_v56 }
 0x1d1   :  { %v2083_v37 = vsel %vm1996_vm9, %v3843_v1, %v2080_v53 }
 0x1d2   :  { %2358 = vcosq.f32 %v2083_v37 }
 0x1d3   :  { %2360 = vsinq.f32 %v2083_v37 }
 0x1dc   :  { %v2359_v47 = vpop.eup %2358 }
 0x1dd   :  { %v2361_v0 = vpop.eup %2360  ;;  %v2095_v5 = vxor.u32 2147483648, %v2359_v47 }
 0x1de   :  { %v2092_v48 = vxor.u32 2147483648, %v2361_v0 }
 0x1df   :  { %v2096_v19 = vsel %vm2094_vm13, %v2095_v5, %v2361_v0 }
 0x1e0   :  { %v2093_v34 = vsel %vm2091_vm15, %v2359_v47, %v2092_v48 }
 0x1e1   :  { %v2097_v42 = vsel %vm2090_vm0, %v2093_v34, %v2096_v19 }
 0x1e2   :  { %v2098_v17 = vsel %vm2087_vm1, nan, %v2097_v42 }
 0x1e3   :  { %v2099_v26 = vadd.f32 %v2098_v17, %v1993_v43 }
 0x1e5   :  { %2100 = vst [vmem:[#allocation8] sm:$0xff] %v2099_v26 }
 0x1e6   :  { %2447 = shalt.err (!%p2444_p0)
}
 0x1e7   :  { %s2448_s25 = scalar_lea.hbm %s4065_s3, 128 }
 0x1e8   :  { %p2449_p1 = scmp.ne.s32.totalorder %s4065_s3, %s2448_s25  ;;  %p2452_p2 = scmp.lt.u32.totalorder %s2448_s25, %s4065_s3 }
 0x1ea   :  { %p2454_p3 = pnand %p2452_p2, %p2449_p1 }
 0x1ec   :  { %2457 = shalt.err (!%p2454_p3)
}
 0x1ed   :  { %2139 = dma.vmem_to_hbm [thread:$0]  %s2137_s21, 128, %s4065_s3, [#allocation9]  }
 0x1ee   :  { %2462 = dma.done.wait [#allocation4], 512  }
 0x1ef   :  { %2463 = vsyncadd [#allocation4], 4294966784 }
 0x1f0   :  { %2464 = dma.done.wait [#allocation9], 128  }
 0x1f1   :  { %2465 = vsyncadd [#allocation9], 4294967168 }
 0x1f2   :  { %2146 = vsyncpa [#allocation3], 1 }
 0x1f3   :  { %2147 = vsyncpa [#allocation6], 1 }
 0x1f4   :  { %2148 = vsyncpa [#allocation4], 1 }
 0x1f5   :  { %2149 = vsyncpa [#allocation9], 1 }

</bundles_post_ra>
